<compile_context>
chip_gen: v7x
topology: tpu7x:2x2x1
jax: 0.10.0
libtpu: 0.0.40
codegen_flags: <defaults>
</compile_context>

<pallas_src>
import functools

import jax
import jax.numpy as jnp
from jax.experimental import pallas as pl
from jax.experimental.pallas import tpu as pltpu


# ----------------------------------------------------------------------------
# Config / synthetic parameters
# ----------------------------------------------------------------------------

class Config:
    vocab_size = 100
    type_vocab_size = 2
    max_pos = 16
    hidden = 32          # embed_dim
    heads = 2
    head_dim = 16
    ffn = 64
    layers = 2
    num_tags = 5


NPAD = 128               # lane-dense padded width of the fused head output


def init_params(cfg, key):
    def nrm(k, shape):
        return jax.random.normal(k, shape, dtype=jnp.float32) * 0.02

    keys = iter(jax.random.split(key, 64))
    p = {
        "word_emb": nrm(next(keys), (cfg.vocab_size, cfg.hidden)),
        "pos_emb": nrm(next(keys), (cfg.max_pos, cfg.hidden)),
        "type_emb": nrm(next(keys), (cfg.type_vocab_size, cfg.hidden)),
        "emb_ln_g": jnp.ones((cfg.hidden,), jnp.float32),
        "emb_ln_b": jnp.zeros((cfg.hidden,), jnp.float32),
        "layers": [],
        "fc_cls_w": nrm(next(keys), (cfg.hidden, 2)),
        "fc_cls_b": jnp.zeros((2,), jnp.float32),
        "fc_seq_w": nrm(next(keys), (cfg.hidden, cfg.num_tags)),
        "fc_seq_b": jnp.zeros((cfg.num_tags,), jnp.float32),
    }
    for _ in range(cfg.layers):
        lyr = {
            "wq": nrm(next(keys), (cfg.hidden, cfg.hidden)),
            "bq": jnp.zeros((cfg.hidden,), jnp.float32),
            "wk": nrm(next(keys), (cfg.hidden, cfg.hidden)),
            "bk": jnp.zeros((cfg.hidden,), jnp.float32),
            "wv": nrm(next(keys), (cfg.hidden, cfg.hidden)),
            "bv": jnp.zeros((cfg.hidden,), jnp.float32),
            "wo": nrm(next(keys), (cfg.hidden, cfg.hidden)),
            "bo": jnp.zeros((cfg.hidden,), jnp.float32),
            "ln1_g": jnp.ones((cfg.hidden,), jnp.float32),
            "ln1_b": jnp.zeros((cfg.hidden,), jnp.float32),
            "w1": nrm(next(keys), (cfg.hidden, cfg.ffn)),
            "b1": jnp.zeros((cfg.ffn,), jnp.float32),
            "w2": nrm(next(keys), (cfg.ffn, cfg.hidden)),
            "b2": jnp.zeros((cfg.hidden,), jnp.float32),
            "ln2_g": jnp.ones((cfg.hidden,), jnp.float32),
            "ln2_b": jnp.zeros((cfg.hidden,), jnp.float32),
        }
        p["layers"].append(lyr)
    return p


def pack_params(params, cfg, seq_len, npad=NPAD):
    """Repack weights for the fused kernel:
      * word/type/pos embedding tables concatenated into ONE gather table
        (in-kernel one-hot matmul gathers word+type+pos in a single MXU op),
      * per-layer QKV fused and layers stacked, matmul weights in bf16,
      * fc_cls | fc_seq concatenated and zero-padded to `npad` output lanes.
    """
    bf16 = jnp.bfloat16
    D = cfg.hidden
    L = params["layers"]

    emb_table = jnp.concatenate(
        [params["word_emb"], params["type_emb"], params["pos_emb"][:seq_len]],
        axis=0)                                                     # [V+TV+S, D]

    pp = {
        "emb_table": emb_table,
        "emb_ln_g": params["emb_ln_g"].reshape(1, D),
        "emb_ln_b": params["emb_ln_b"].reshape(1, D),
        "wqkv": jnp.stack([jnp.concatenate([l["wq"], l["wk"], l["wv"]], axis=1)
                           for l in L]).astype(bf16),               # [L, D, 3D]
        "bqkv": jnp.stack([jnp.concatenate([l["bq"], l["bk"], l["bv"]])
                           for l in L])[:, None, :],                # [L, 1, 3D]
        "wo": jnp.stack([l["wo"] for l in L]).astype(bf16),         # [L, D, D]
        "bo": jnp.stack([l["bo"] for l in L])[:, None, :],
        "ln1_g": jnp.stack([l["ln1_g"] for l in L])[:, None, :],
        "ln1_b": jnp.stack([l["ln1_b"] for l in L])[:, None, :],
        "w1": jnp.stack([l["w1"] for l in L]).astype(bf16),         # [L, D, F]
        "b1": jnp.stack([l["b1"] for l in L])[:, None, :],
        "w2": jnp.stack([l["w2"] for l in L]).astype(bf16),         # [L, F, D]
        "b2": jnp.stack([l["b2"] for l in L])[:, None, :],
        "ln2_g": jnp.stack([l["ln2_g"] for l in L])[:, None, :],
        "ln2_b": jnp.stack([l["ln2_b"] for l in L])[:, None, :],
    }
    fc_w = jnp.concatenate([params["fc_cls_w"], params["fc_seq_w"]], axis=1)
    fc_b = jnp.concatenate([params["fc_cls_b"], params["fc_seq_b"]])
    nout = fc_w.shape[1]
    pp["fc_w"] = jnp.pad(fc_w, ((0, 0), (0, npad - nout))).astype(bf16)  # [D, NPAD]
    pp["fc_b"] = jnp.pad(fc_b, (0, npad - nout)).reshape(1, npad)        # [1, NPAD]
    return pp


WEIGHT_ORDER = ("emb_table", "emb_ln_g", "emb_ln_b",
                "wqkv", "bqkv", "wo", "bo", "ln1_g", "ln1_b",
                "w1", "b1", "w2", "b2", "ln2_g", "ln2_b",
                "fc_w", "fc_b")


# ----------------------------------------------------------------------------
# Fused encoder kernel: one grid step == Bt batch elements, full forward pass
# ----------------------------------------------------------------------------

def _encoder_kernel(ids_ref, types_ref, mask_ref,
                    emb_tbl_ref, emb_g_ref, emb_b_ref,
                    wqkv_ref, bqkv_ref, wo_ref, bo_ref, ln1_g_ref, ln1_b_ref,
                    w1_ref, b1_ref, w2_ref, b2_ref, ln2_g_ref, ln2_b_ref,
                    fc_w_ref, fc_b_ref,
                    out_ref,
                    *, num_layers, num_heads, head_dim,
                    vocab_size, type_vocab, eps=1e-12):
    f32, bf16 = jnp.float32, jnp.bfloat16
    Bt, S, _ = ids_ref.shape
    D = emb_g_ref.shape[-1]
    VT = emb_tbl_ref.shape[0]              # vocab + type_vocab + seq_len
    npad = fc_w_ref.shape[1]
    H, hd = num_heads, head_dim
    R = Bt * S                             # rows of the fused activation slab
    scale = 1.0 / (hd ** 0.5)

    def ln(x, g, b):
        mu = jnp.mean(x, axis=-1, keepdims=True)
        xc = x - mu
        var = jnp.mean(xc * xc, axis=-1, keepdims=True)
        return xc * jax.lax.rsqrt(var + eps) * g + b

    # --- fused embedding lookup: word + type + position gathered by ONE
    #     exact one-hot f32 matmul against the resident [VT, D] table
    #     (MXU M-dim = Bt*S rows; no XLA gather, no h_emb HBM round-trip) ---
    ids = ids_ref[...]                                        # [Bt, S, 1] i32
    typ = types_ref[...]                                      # [Bt, S, 1] i32
    col = jax.lax.broadcasted_iota(jnp.int32, (Bt, S, VT), 2)
    pos = jax.lax.broadcasted_iota(jnp.int32, (Bt, S, VT), 1)
    hot = ((col == ids)
           | (col == typ + vocab_size)
           | (col == pos + (vocab_size + type_vocab))).astype(f32)
    x = jnp.dot(hot.reshape(R, VT), emb_tbl_ref[...],
                preferred_element_type=f32)                   # [R, D]
    x = ln(x, emb_g_ref[...], emb_b_ref[...])

    # --- additive key-mask bias, computed in-kernel and broadcast ONCE
    #     (hoisted out of the head/layer loops) ---
    bias = (mask_ref[...].astype(f32) - 1.0) * 1e9            # [Bt, 1, S]
    bias_b = jnp.broadcast_to(bias, (Bt, S, S))

    for l in range(num_layers):                               # static unroll
        # fused QKV projection: one MXU pass over the [R, D] slab
        qkv = jnp.dot(x.astype(bf16), wqkv_ref[l],
                      preferred_element_type=f32) + bqkv_ref[l]   # [R, 3D]
        qkv3 = qkv.reshape(Bt, S, 3 * D)

        # attention: batch-dim einsums (explicit layout), static head unroll
        ctx_heads = []
        for h in range(H):
            q = qkv3[:, :, h * hd:(h + 1) * hd].astype(bf16)            # [Bt,S,hd]
            k = qkv3[:, :, D + h * hd:D + (h + 1) * hd].astype(bf16)
            v = qkv3[:, :, 2 * D + h * hd:2 * D + (h + 1) * hd].astype(bf16)
            s = jnp.einsum('bqd,bkd->bqk', q, k,
                           preferred_element_type=f32) * scale + bias_b  # [Bt,S,S]
            s = s - jnp.max(s, axis=-1, keepdims=True)
            p = jnp.exp(s)
            p = p * pl.reciprocal(jnp.sum(p, axis=-1, keepdims=True),
                                  approx=True)
            ctx_heads.append(jnp.einsum('bqk,bkd->bqd', p.astype(bf16), v,
                                        preferred_element_type=f32))     # [Bt,S,hd]
        ctx = jnp.concatenate(ctx_heads, axis=-1).reshape(R, D)

        # output projection + residual + LayerNorm (fused epilogue)
        attn_out = jnp.dot(ctx.astype(bf16), wo_ref[l],
                           preferred_element_type=f32) + bo_ref[l]
        x = ln(x + attn_out, ln1_g_ref[l], ln1_b_ref[l])

        # FFN: matmul + bias + GELU fused, matmul + residual + LN fused
        hmid = jnp.dot(x.astype(bf16), w1_ref[l],
                       preferred_element_type=f32) + b1_ref[l]
        # TODO(synk): HF BERT uses the exact erf GELU; tanh approximation is
        # kept here (guaranteed Mosaic lowering), max abs diff ~1e-3.
        hmid = jax.nn.gelu(hmid)
        ffn_out = jnp.dot(hmid.astype(bf16), w2_ref[l],
                          preferred_element_type=f32) + b2_ref[l]
        x = ln(x + ffn_out, ln2_g_ref[l], ln2_b_ref[l])

    # --- fused heads: [fc_cls | fc_seq | zero-pad] -> lane-dense [R, 128] ---
    logits = jnp.dot(x.astype(bf16), fc_w_ref[...],
                     preferred_element_type=f32) + fc_b_ref[...]
    out_ref[...] = logits.reshape(Bt, S, npad).astype(out_ref.dtype)


def choose_batch_block(batch, seq, target_rows=256, min_rows_per_step=128):
    """Pick Bt: fill the MXU M dim (~256 rows/step on v6e/v7x); keep >= 2
    grid steps (v7x has two TensorCores) as long as each step still gets
    >= min_rows_per_step rows. Bt must divide the batch."""
    bt = max(1, min(batch, max(1, target_rows // seq)))
    while batch % bt:
        bt -= 1
    if batch // bt < 2:
        half = bt // 2
        while half >= 1 and batch % half:
            half -= 1
        if half >= 1 and half * seq >= min_rows_per_step:
            bt = half
    return bt


def encoder_forward(input_ids, token_type_ids, attention_mask, pp, cfg):
    """Runs the entire encoder + heads in ONE pallas_call.
    Returns padded logits [B, S, NPAD] (cols 0:2 = cls, 2:2+T = seq)."""
    B, S = input_ids.shape
    bt = choose_batch_block(B, S)
    npad = pp["fc_w"].shape[1]

    # int inputs, reshaped so the last two block dims equal the full dims
    ids3 = input_ids.astype(jnp.int32).reshape(B, S, 1)
    typ3 = token_type_ids.astype(jnp.int32).reshape(B, S, 1)
    msk3 = attention_mask.astype(jnp.int32).reshape(B, 1, S)

    weights = [pp[k] for k in WEIGHT_ORDER]
    kernel = functools.partial(_encoder_kernel,
                               num_layers=cfg.layers,
                               num_heads=cfg.heads,
                               head_dim=cfg.head_dim,
                               vocab_size=cfg.vocab_size,
                               type_vocab=cfg.type_vocab_size)

    def rep_spec(a):
        # weight is fully resident in VMEM; same whole-array block each step
        return pl.BlockSpec(a.shape, lambda i, _nd=a.ndim: (0,) * _nd)

    return pl.pallas_call(
        kernel,
        out_shape=jax.ShapeDtypeStruct((B, S, npad), jnp.float32),
        grid=(B // bt,),
        in_specs=([pl.BlockSpec((bt, S, 1), lambda i: (i, 0, 0)),
                   pl.BlockSpec((bt, S, 1), lambda i: (i, 0, 0)),
                   pl.BlockSpec((bt, 1, S), lambda i: (i, 0, 0))]
                  + [rep_spec(a) for a in weights]),
        out_specs=pl.BlockSpec((bt, S, npad), lambda i: (i, 0, 0)),
        compiler_params=pltpu.CompilerParams(
            dimension_semantics=("parallel",)),   # v7x: 2 TCs split the grid
    )(ids3, typ3, msk3, *weights)


# ----------------------------------------------------------------------------
# BertEncoderNet.forward equivalent
# ----------------------------------------------------------------------------

def bert_encoder_net_forward(params, cfg, input_ids, token_type_ids,
                             attention_mask):
    """Returns (logits_cls [B, 2], logits_seq [B, S, num_tags])."""
    B, S = input_ids.shape
    pp = pack_params(params, cfg, S, NPAD)

    logits = encoder_forward(input_ids, token_type_ids, attention_mask,
                             pp, cfg)                              # [B,S,NPAD]
    logits_cls = logits[:, 0, 0:2]                                 # [B, 2]
    logits_seq = logits[:, :, 2:2 + cfg.num_tags]                  # [B, S, T]

    # TODO(synk): calc_cls_loss / calc_seq_loss / calc_mtl_loss are training
    # utilities, not part of forward(); not translated here.
    return logits_cls, logits_seq


# ----------------------------------------------------------------------------
# Driver
# ----------------------------------------------------------------------------

if __name__ == "__main__":
    cfg = Config()
    B, S = 2, 8

    key = jax.random.PRNGKey(0)
    k_param, k_ids = jax.random.split(key)

    params = init_params(cfg, k_param)

    input_ids = jax.random.randint(k_ids, (B, S), 0, cfg.vocab_size,
                                   dtype=jnp.int32)
    token_type_ids = jnp.zeros((B, S), dtype=jnp.int32)
    attention_mask = jnp.ones((B, S), dtype=jnp.int32)
    # mask out the last two tokens of the second example (padding)
    attention_mask = attention_mask.at[1, -2:].set(0)

    fwd = jax.jit(functools.partial(bert_encoder_net_forward, params, cfg))
    logits_cls, logits_seq = fwd(input_ids, token_type_ids, attention_mask)

    jax.block_until_ready((logits_cls, logits_seq))
    assert logits_cls.shape == (B, 2)
    assert logits_seq.shape == (B, S, cfg.num_tags)
    print("KERNEL_OK")
</pallas_src>

<mosaic_0001>
module attributes {stable_mosaic.version = 11 : i64} {
  func.func @_encoder_kernel(%arg0: i32, %arg1: memref<2x8x1xi32, #tpu.memory_space<vmem>>, %arg2: memref<2x8x1xi32, #tpu.memory_space<vmem>>, %arg3: memref<2x1x8xi32, #tpu.memory_space<vmem>>, %arg4: memref<110x32xf32, #tpu.memory_space<vmem>>, %arg5: memref<1x32xf32, #tpu.memory_space<vmem>>, %arg6: memref<1x32xf32, #tpu.memory_space<vmem>>, %arg7: memref<2x32x96xbf16, #tpu.memory_space<vmem>>, %arg8: memref<2x1x96xf32, #tpu.memory_space<vmem>>, %arg9: memref<2x32x32xbf16, #tpu.memory_space<vmem>>, %arg10: memref<2x1x32xf32, #tpu.memory_space<vmem>>, %arg11: memref<2x1x32xf32, #tpu.memory_space<vmem>>, %arg12: memref<2x1x32xf32, #tpu.memory_space<vmem>>, %arg13: memref<2x32x64xbf16, #tpu.memory_space<vmem>>, %arg14: memref<2x1x64xf32, #tpu.memory_space<vmem>>, %arg15: memref<2x64x32xbf16, #tpu.memory_space<vmem>>, %arg16: memref<2x1x32xf32, #tpu.memory_space<vmem>>, %arg17: memref<2x1x32xf32, #tpu.memory_space<vmem>>, %arg18: memref<2x1x32xf32, #tpu.memory_space<vmem>>, %arg19: memref<32x128xbf16, #tpu.memory_space<vmem>>, %arg20: memref<1x128xf32, #tpu.memory_space<vmem>>, %arg21: memref<2x8x128xf32, #tpu.memory_space<vmem>>) attributes {dimension_semantics = [#tpu.dimension_semantics<parallel>], iteration_bounds = array<i64: 1>, scalar_prefetch = 0 : i64, scratch_operands = 0 : i64, tpu.core_type = #tpu.core_type<tc>, window_params = [{transform_indices = @transform_0, window_bounds = array<i64: 2, 8, 1>}, {transform_indices = @transform_1, window_bounds = array<i64: 2, 8, 1>}, {transform_indices = @transform_2, window_bounds = array<i64: 2, 1, 8>}, {pipeline_mode = #tpu.pipeline_mode<synchronous>, transform_indices = @transform_3, window_bounds = array<i64: 110, 32>}, {pipeline_mode = #tpu.pipeline_mode<synchronous>, transform_indices = @transform_4, window_bounds = array<i64: 1, 32>}, {pipeline_mode = #tpu.pipeline_mode<synchronous>, transform_indices = @transform_5, window_bounds = array<i64: 1, 32>}, {pipeline_mode = #tpu.pipeline_mode<synchronous>, transform_indices = @transform_6, window_bounds = array<i64: 2, 32, 96>}, {pipeline_mode = #tpu.pipeline_mode<synchronous>, transform_indices = @transform_7, window_bounds = array<i64: 2, 1, 96>}, {pipeline_mode = #tpu.pipeline_mode<synchronous>, transform_indices = @transform_8, window_bounds = array<i64: 2, 32, 32>}, {pipeline_mode = #tpu.pipeline_mode<synchronous>, transform_indices = @transform_9, window_bounds = array<i64: 2, 1, 32>}, {pipeline_mode = #tpu.pipeline_mode<synchronous>, transform_indices = @transform_10, window_bounds = array<i64: 2, 1, 32>}, {pipeline_mode = #tpu.pipeline_mode<synchronous>, transform_indices = @transform_11, window_bounds = array<i64: 2, 1, 32>}, {pipeline_mode = #tpu.pipeline_mode<synchronous>, transform_indices = @transform_12, window_bounds = array<i64: 2, 32, 64>}, {pipeline_mode = #tpu.pipeline_mode<synchronous>, transform_indices = @transform_13, window_bounds = array<i64: 2, 1, 64>}, {pipeline_mode = #tpu.pipeline_mode<synchronous>, transform_indices = @transform_14, window_bounds = array<i64: 2, 64, 32>}, {pipeline_mode = #tpu.pipeline_mode<synchronous>, transform_indices = @transform_15, window_bounds = array<i64: 2, 1, 32>}, {pipeline_mode = #tpu.pipeline_mode<synchronous>, transform_indices = @transform_16, window_bounds = array<i64: 2, 1, 32>}, {pipeline_mode = #tpu.pipeline_mode<synchronous>, transform_indices = @transform_17, window_bounds = array<i64: 2, 1, 32>}, {pipeline_mode = #tpu.pipeline_mode<synchronous>, transform_indices = @transform_18, window_bounds = array<i64: 32, 128>}, {pipeline_mode = #tpu.pipeline_mode<synchronous>, transform_indices = @transform_19, window_bounds = array<i64: 1, 128>}, {transform_indices = @transform_20, window_bounds = array<i64: 2, 8, 128>}]} {
    %c0 = arith.constant 0 : index
    %c0_0 = arith.constant 0 : index
    %c0_1 = arith.constant 0 : index
    %0 = vector.load %arg1[%c0, %c0_0, %c0_1] : memref<2x8x1xi32, #tpu.memory_space<vmem>>, vector<2x8x1xi32>
    %c0_2 = arith.constant 0 : index
    %c0_3 = arith.constant 0 : index
    %c0_4 = arith.constant 0 : index
    %1 = vector.load %arg2[%c0_2, %c0_3, %c0_4] : memref<2x8x1xi32, #tpu.memory_space<vmem>>, vector<2x8x1xi32>
    %2 = tpu.iota {dimensions = array<i32: 2>} : vector<2x8x110xi32>
    %3 = tpu.iota {dimensions = array<i32: 1>} : vector<2x8x110xi32>
    %4 = vector.broadcast %0 : vector<2x8x1xi32> to vector<2x8x110xi32>
    %5 = arith.cmpi eq, %2, %4 : vector<2x8x110xi32>
    %c100_i32 = arith.constant 100 : i32
    %6 = vector.broadcast %c100_i32 : i32 to vector<2x8x1xi32>
    %7 = arith.addi %1, %6 : vector<2x8x1xi32>
    %8 = vector.broadcast %7 : vector<2x8x1xi32> to vector<2x8x110xi32>
    %9 = arith.cmpi eq, %2, %8 : vector<2x8x110xi32>
    %10 = arith.ori %5, %9 : vector<2x8x110xi1>
    %c102_i32 = arith.constant 102 : i32
    %11 = vector.broadcast %c102_i32 : i32 to vector<2x8x110xi32>
    %12 = arith.addi %3, %11 : vector<2x8x110xi32>
    %13 = arith.cmpi eq, %2, %12 : vector<2x8x110xi32>
    %14 = arith.ori %10, %13 : vector<2x8x110xi1>
    %15 = arith.extui %14 : vector<2x8x110xi1> to vector<2x8x110xi32>
    %16 = arith.sitofp %15 : vector<2x8x110xi32> to vector<2x8x110xf32>
    %17 = vector.shape_cast %16 : vector<2x8x110xf32> to vector<16x110xf32>
    %c0_5 = arith.constant 0 : index
    %c0_6 = arith.constant 0 : index
    %18 = vector.load %arg4[%c0_5, %c0_6] : memref<110x32xf32, #tpu.memory_space<vmem>>, vector<110x32xf32>
    %cst = arith.constant dense<0.000000e+00> : vector<16x32xf32>
    %19 = tpu.matmul %17, %18, %cst {dimension_numbers = #tpu.dot_dimension_numbers<[1], [0], [0], [1], [0, 0, 1, 1], [], []>} : vector<16x110xf32>, vector<110x32xf32>, vector<16x32xf32> -> vector<16x32xf32>
    %c0_7 = arith.constant 0 : index
    %c0_8 = arith.constant 0 : index
    %20 = vector.load %arg5[%c0_7, %c0_8] : memref<1x32xf32, #tpu.memory_space<vmem>>, vector<1x32xf32>
    %c0_9 = arith.constant 0 : index
    %c0_10 = arith.constant 0 : index
    %21 = vector.load %arg6[%c0_9, %c0_10] : memref<1x32xf32, #tpu.memory_space<vmem>>, vector<1x32xf32>
    %cst_11 = arith.constant dense<0.000000e+00> : vector<16xf32>
    %22 = vector.multi_reduction <add>, %19, %cst_11 [1] : vector<16x32xf32> to vector<16xf32>
    %23 = vector.shape_cast %22 : vector<16xf32> to vector<16x1xf32>
    %cst_12 = arith.constant 3.200000e+01 : f32
    %24 = vector.broadcast %cst_12 : f32 to vector<16x1xf32>
    %25 = arith.divf %23, %24 : vector<16x1xf32>
    %26 = vector.broadcast %25 : vector<16x1xf32> to vector<16x32xf32>
    %27 = arith.subf %19, %26 : vector<16x32xf32>
    %28 = arith.mulf %27, %27 : vector<16x32xf32>
    %cst_13 = arith.constant dense<0.000000e+00> : vector<16xf32>
    %29 = vector.multi_reduction <add>, %28, %cst_13 [1] : vector<16x32xf32> to vector<16xf32>
    %30 = vector.shape_cast %29 : vector<16xf32> to vector<16x1xf32>
    %cst_14 = arith.constant 3.200000e+01 : f32
    %31 = vector.broadcast %cst_14 : f32 to vector<16x1xf32>
    %32 = arith.divf %30, %31 : vector<16x1xf32>
    %cst_15 = arith.constant 9.99999996E-13 : f32
    %33 = vector.broadcast %cst_15 : f32 to vector<16x1xf32>
    %34 = arith.addf %32, %33 : vector<16x1xf32>
    %35 = math.rsqrt %34 : vector<16x1xf32>
    %36 = vector.broadcast %35 : vector<16x1xf32> to vector<16x32xf32>
    %37 = arith.mulf %27, %36 : vector<16x32xf32>
    %38 = vector.broadcast %20 : vector<1x32xf32> to vector<16x32xf32>
    %39 = arith.mulf %37, %38 : vector<16x32xf32>
    %40 = vector.broadcast %21 : vector<1x32xf32> to vector<16x32xf32>
    %41 = arith.addf %39, %40 : vector<16x32xf32>
    %c0_16 = arith.constant 0 : index
    %c0_17 = arith.constant 0 : index
    %c0_18 = arith.constant 0 : index
    %42 = vector.load %arg3[%c0_16, %c0_17, %c0_18] : memref<2x1x8xi32, #tpu.memory_space<vmem>>, vector<2x1x8xi32>
    %43 = arith.sitofp %42 : vector<2x1x8xi32> to vector<2x1x8xf32>
    %cst_19 = arith.constant 1.000000e+00 : f32
    %44 = vector.broadcast %cst_19 : f32 to vector<2x1x8xf32>
    %45 = arith.subf %43, %44 : vector<2x1x8xf32>
    %cst_20 = arith.constant 1.000000e+09 : f32
    %46 = vector.broadcast %cst_20 : f32 to vector<2x1x8xf32>
    %47 = arith.mulf %45, %46 : vector<2x1x8xf32>
    %48 = vector.shape_cast %47 : vector<2x1x8xf32> to vector<2x1x8xf32>
    %49 = vector.broadcast %48 : vector<2x1x8xf32> to vector<2x8x8xf32>
    %50 = arith.truncf %41 : vector<16x32xf32> to vector<16x32xbf16>
    %c0_21 = arith.constant 0 : index
    %c0_22 = arith.constant 0 : index
    %c0_23 = arith.constant 0 : index
    %51 = vector.load %arg7[%c0_21, %c0_22, %c0_23] : memref<2x32x96xbf16, #tpu.memory_space<vmem>>, vector<1x32x96xbf16>
    %52 = vector.shape_cast %51 : vector<1x32x96xbf16> to vector<32x96xbf16>
    %cst_24 = arith.constant dense<0.000000e+00> : vector<16x96xf32>
    %53 = tpu.matmul %50, %52, %cst_24 {dimension_numbers = #tpu.dot_dimension_numbers<[1], [0], [0], [1], [0, 0, 1, 1], [], []>} : vector<16x32xbf16>, vector<32x96xbf16>, vector<16x96xf32> -> vector<16x96xf32>
    %c0_25 = arith.constant 0 : index
    %c0_26 = arith.constant 0 : index
    %c0_27 = arith.constant 0 : index
    %54 = vector.load %arg8[%c0_25, %c0_26, %c0_27] : memref<2x1x96xf32, #tpu.memory_space<vmem>>, vector<1x1x96xf32>
    %55 = vector.shape_cast %54 : vector<1x1x96xf32> to vector<1x96xf32>
    %56 = vector.broadcast %55 : vector<1x96xf32> to vector<16x96xf32>
    %57 = arith.addf %53, %56 : vector<16x96xf32>
    %58 = vector.shape_cast %57 : vector<16x96xf32> to vector<2x8x96xf32>
    %59 = vector.extract_strided_slice %58 {offsets = [0, 0, 0], sizes = [2, 8, 16], strides = [1, 1, 1]} : vector<2x8x96xf32> to vector<2x8x16xf32>
    %60 = arith.truncf %59 : vector<2x8x16xf32> to vector<2x8x16xbf16>
    %61 = vector.extract_strided_slice %58 {offsets = [0, 0, 32], sizes = [2, 8, 16], strides = [1, 1, 1]} : vector<2x8x96xf32> to vector<2x8x16xf32>
    %62 = arith.truncf %61 : vector<2x8x16xf32> to vector<2x8x16xbf16>
    %63 = vector.extract_strided_slice %58 {offsets = [0, 0, 64], sizes = [2, 8, 16], strides = [1, 1, 1]} : vector<2x8x96xf32> to vector<2x8x16xf32>
    %64 = arith.truncf %63 : vector<2x8x16xf32> to vector<2x8x16xbf16>
    "tpu.trace_start"() <{level = 10 : i32, message = "bqd,bkd->bqk"}> : () -> ()
    %cst_28 = arith.constant dense<0.000000e+00> : vector<2x8x8xf32>
    %65 = tpu.matmul %60, %62, %cst_28 {dimension_numbers = #tpu.dot_dimension_numbers<[2], [2], [1], [1], [0, 0, 0, 1, 1, 1], [0], [0]>} : vector<2x8x16xbf16>, vector<2x8x16xbf16>, vector<2x8x8xf32> -> vector<2x8x8xf32>
    "tpu.trace_stop"() : () -> ()
    %cst_29 = arith.constant 2.500000e-01 : f32
    %66 = vector.broadcast %cst_29 : f32 to vector<2x8x8xf32>
    %67 = arith.mulf %65, %66 : vector<2x8x8xf32>
    %68 = arith.addf %67, %49 : vector<2x8x8xf32>
    %cst_30 = arith.constant dense<0xFF800000> : vector<2x8xf32>
    %69 = vector.multi_reduction <maximumf>, %68, %cst_30 [2] : vector<2x8x8xf32> to vector<2x8xf32>
    %70 = vector.shape_cast %69 : vector<2x8xf32> to vector<2x8x1xf32>
    %71 = vector.broadcast %70 : vector<2x8x1xf32> to vector<2x8x8xf32>
    %72 = arith.subf %68, %71 : vector<2x8x8xf32>
    %73 = math.exp %72 : vector<2x8x8xf32>
    %cst_31 = arith.constant dense<0.000000e+00> : vector<2x8xf32>
    %74 = vector.multi_reduction <add>, %73, %cst_31 [2] : vector<2x8x8xf32> to vector<2x8xf32>
    %75 = vector.shape_cast %74 : vector<2x8xf32> to vector<2x8x1xf32>
    %76 = tpu.reciprocal %75 {approx = true} : vector<2x8x1xf32> -> vector<2x8x1xf32>
    %77 = vector.broadcast %76 : vector<2x8x1xf32> to vector<2x8x8xf32>
    %78 = arith.mulf %73, %77 : vector<2x8x8xf32>
    %79 = arith.truncf %78 : vector<2x8x8xf32> to vector<2x8x8xbf16>
    "tpu.trace_start"() <{level = 10 : i32, message = "bqk,bkd->bqd"}> : () -> ()
    %cst_32 = arith.constant dense<0.000000e+00> : vector<2x8x16xf32>
    %80 = tpu.matmul %79, %64, %cst_32 {dimension_numbers = #tpu.dot_dimension_numbers<[2], [1], [1], [2], [0, 0, 0, 1, 1, 2], [0], [0]>} : vector<2x8x8xbf16>, vector<2x8x16xbf16>, vector<2x8x16xf32> -> vector<2x8x16xf32>
    "tpu.trace_stop"() : () -> ()
    %81 = vector.extract_strided_slice %58 {offsets = [0, 0, 16], sizes = [2, 8, 16], strides = [1, 1, 1]} : vector<2x8x96xf32> to vector<2x8x16xf32>
    %82 = arith.truncf %81 : vector<2x8x16xf32> to vector<2x8x16xbf16>
    %83 = vector.extract_strided_slice %58 {offsets = [0, 0, 48], sizes = [2, 8, 16], strides = [1, 1, 1]} : vector<2x8x96xf32> to vector<2x8x16xf32>
    %84 = arith.truncf %83 : vector<2x8x16xf32> to vector<2x8x16xbf16>
    %85 = vector.extract_strided_slice %58 {offsets = [0, 0, 80], sizes = [2, 8, 16], strides = [1, 1, 1]} : vector<2x8x96xf32> to vector<2x8x16xf32>
    %86 = arith.truncf %85 : vector<2x8x16xf32> to vector<2x8x16xbf16>
    "tpu.trace_start"() <{level = 10 : i32, message = "bqd,bkd->bqk"}> : () -> ()
    %cst_33 = arith.constant dense<0.000000e+00> : vector<2x8x8xf32>
    %87 = tpu.matmul %82, %84, %cst_33 {dimension_numbers = #tpu.dot_dimension_numbers<[2], [2], [1], [1], [0, 0, 0, 1, 1, 1], [0], [0]>} : vector<2x8x16xbf16>, vector<2x8x16xbf16>, vector<2x8x8xf32> -> vector<2x8x8xf32>
    "tpu.trace_stop"() : () -> ()
    %cst_34 = arith.constant 2.500000e-01 : f32
    %88 = vector.broadcast %cst_34 : f32 to vector<2x8x8xf32>
    %89 = arith.mulf %87, %88 : vector<2x8x8xf32>
    %90 = arith.addf %89, %49 : vector<2x8x8xf32>
    %cst_35 = arith.constant dense<0xFF800000> : vector<2x8xf32>
    %91 = vector.multi_reduction <maximumf>, %90, %cst_35 [2] : vector<2x8x8xf32> to vector<2x8xf32>
    %92 = vector.shape_cast %91 : vector<2x8xf32> to vector<2x8x1xf32>
    %93 = vector.broadcast %92 : vector<2x8x1xf32> to vector<2x8x8xf32>
    %94 = arith.subf %90, %93 : vector<2x8x8xf32>
    %95 = math.exp %94 : vector<2x8x8xf32>
    %cst_36 = arith.constant dense<0.000000e+00> : vector<2x8xf32>
    %96 = vector.multi_reduction <add>, %95, %cst_36 [2] : vector<2x8x8xf32> to vector<2x8xf32>
    %97 = vector.shape_cast %96 : vector<2x8xf32> to vector<2x8x1xf32>
    %98 = tpu.reciprocal %97 {approx = true} : vector<2x8x1xf32> -> vector<2x8x1xf32>
    %99 = vector.broadcast %98 : vector<2x8x1xf32> to vector<2x8x8xf32>
    %100 = arith.mulf %95, %99 : vector<2x8x8xf32>
    %101 = arith.truncf %100 : vector<2x8x8xf32> to vector<2x8x8xbf16>
    "tpu.trace_start"() <{level = 10 : i32, message = "bqk,bkd->bqd"}> : () -> ()
    %cst_37 = arith.constant dense<0.000000e+00> : vector<2x8x16xf32>
    %102 = tpu.matmul %101, %86, %cst_37 {dimension_numbers = #tpu.dot_dimension_numbers<[2], [1], [1], [2], [0, 0, 0, 1, 1, 2], [0], [0]>} : vector<2x8x8xbf16>, vector<2x8x16xbf16>, vector<2x8x16xf32> -> vector<2x8x16xf32>
    "tpu.trace_stop"() : () -> ()
    %103 = tpu.concatenate %80, %102 in 2 : vector<2x8x16xf32>, vector<2x8x16xf32> -> vector<2x8x32xf32>
    %104 = vector.shape_cast %103 : vector<2x8x32xf32> to vector<16x32xf32>
    %105 = arith.truncf %104 : vector<16x32xf32> to vector<16x32xbf16>
    %c0_38 = arith.constant 0 : index
    %c0_39 = arith.constant 0 : index
    %c0_40 = arith.constant 0 : index
    %106 = vector.load %arg9[%c0_38, %c0_39, %c0_40] : memref<2x32x32xbf16, #tpu.memory_space<vmem>>, vector<1x32x32xbf16>
    %107 = vector.shape_cast %106 : vector<1x32x32xbf16> to vector<32x32xbf16>
    %cst_41 = arith.constant dense<0.000000e+00> : vector<16x32xf32>
    %108 = tpu.matmul %105, %107, %cst_41 {dimension_numbers = #tpu.dot_dimension_numbers<[1], [0], [0], [1], [0, 0, 1, 1], [], []>} : vector<16x32xbf16>, vector<32x32xbf16>, vector<16x32xf32> -> vector<16x32xf32>
    %c0_42 = arith.constant 0 : index
    %c0_43 = arith.constant 0 : index
    %c0_44 = arith.constant 0 : index
    %109 = vector.load %arg10[%c0_42, %c0_43, %c0_44] : memref<2x1x32xf32, #tpu.memory_space<vmem>>, vector<1x1x32xf32>
    %110 = vector.shape_cast %109 : vector<1x1x32xf32> to vector<1x32xf32>
    %111 = vector.broadcast %110 : vector<1x32xf32> to vector<16x32xf32>
    %112 = arith.addf %108, %111 : vector<16x32xf32>
    %113 = arith.addf %41, %112 : vector<16x32xf32>
    %c0_45 = arith.constant 0 : index
    %c0_46 = arith.constant 0 : index
    %c0_47 = arith.constant 0 : index
    %114 = vector.load %arg11[%c0_45, %c0_46, %c0_47] : memref<2x1x32xf32, #tpu.memory_space<vmem>>, vector<1x1x32xf32>
    %115 = vector.shape_cast %114 : vector<1x1x32xf32> to vector<1x32xf32>
    %c0_48 = arith.constant 0 : index
    %c0_49 = arith.constant 0 : index
    %c0_50 = arith.constant 0 : index
    %116 = vector.load %arg12[%c0_48, %c0_49, %c0_50] : memref<2x1x32xf32, #tpu.memory_space<vmem>>, vector<1x1x32xf32>
    %117 = vector.shape_cast %116 : vector<1x1x32xf32> to vector<1x32xf32>
    %cst_51 = arith.constant dense<0.000000e+00> : vector<16xf32>
    %118 = vector.multi_reduction <add>, %113, %cst_51 [1] : vector<16x32xf32> to vector<16xf32>
    %119 = vector.shape_cast %118 : vector<16xf32> to vector<16x1xf32>
    %cst_52 = arith.constant 3.200000e+01 : f32
    %120 = vector.broadcast %cst_52 : f32 to vector<16x1xf32>
    %121 = arith.divf %119, %120 : vector<16x1xf32>
    %122 = vector.broadcast %121 : vector<16x1xf32> to vector<16x32xf32>
    %123 = arith.subf %113, %122 : vector<16x32xf32>
    %124 = arith.mulf %123, %123 : vector<16x32xf32>
    %cst_53 = arith.constant dense<0.000000e+00> : vector<16xf32>
    %125 = vector.multi_reduction <add>, %124, %cst_53 [1] : vector<16x32xf32> to vector<16xf32>
    %126 = vector.shape_cast %125 : vector<16xf32> to vector<16x1xf32>
    %cst_54 = arith.constant 3.200000e+01 : f32
    %127 = vector.broadcast %cst_54 : f32 to vector<16x1xf32>
    %128 = arith.divf %126, %127 : vector<16x1xf32>
    %cst_55 = arith.constant 9.99999996E-13 : f32
    %129 = vector.broadcast %cst_55 : f32 to vector<16x1xf32>
    %130 = arith.addf %128, %129 : vector<16x1xf32>
    %131 = math.rsqrt %130 : vector<16x1xf32>
    %132 = vector.broadcast %131 : vector<16x1xf32> to vector<16x32xf32>
    %133 = arith.mulf %123, %132 : vector<16x32xf32>
    %134 = vector.broadcast %115 : vector<1x32xf32> to vector<16x32xf32>
    %135 = arith.mulf %133, %134 : vector<16x32xf32>
    %136 = vector.broadcast %117 : vector<1x32xf32> to vector<16x32xf32>
    %137 = arith.addf %135, %136 : vector<16x32xf32>
    %138 = arith.truncf %137 : vector<16x32xf32> to vector<16x32xbf16>
    %c0_56 = arith.constant 0 : index
    %c0_57 = arith.constant 0 : index
    %c0_58 = arith.constant 0 : index
    %139 = vector.load %arg13[%c0_56, %c0_57, %c0_58] : memref<2x32x64xbf16, #tpu.memory_space<vmem>>, vector<1x32x64xbf16>
    %140 = vector.shape_cast %139 : vector<1x32x64xbf16> to vector<32x64xbf16>
    %cst_59 = arith.constant dense<0.000000e+00> : vector<16x64xf32>
    %141 = tpu.matmul %138, %140, %cst_59 {dimension_numbers = #tpu.dot_dimension_numbers<[1], [0], [0], [1], [0, 0, 1, 1], [], []>} : vector<16x32xbf16>, vector<32x64xbf16>, vector<16x64xf32> -> vector<16x64xf32>
    %c0_60 = arith.constant 0 : index
    %c0_61 = arith.constant 0 : index
    %c0_62 = arith.constant 0 : index
    %142 = vector.load %arg14[%c0_60, %c0_61, %c0_62] : memref<2x1x64xf32, #tpu.memory_space<vmem>>, vector<1x1x64xf32>
    %143 = vector.shape_cast %142 : vector<1x1x64xf32> to vector<1x64xf32>
    %144 = vector.broadcast %143 : vector<1x64xf32> to vector<16x64xf32>
    %145 = arith.addf %141, %144 : vector<16x64xf32>
    %146 = arith.mulf %145, %145 : vector<16x64xf32>
    %147 = arith.mulf %145, %146 : vector<16x64xf32>
    %cst_63 = arith.constant 4.471500e-02 : f32
    %148 = vector.broadcast %cst_63 : f32 to vector<16x64xf32>
    %149 = arith.mulf %148, %147 : vector<16x64xf32>
    %150 = arith.addf %145, %149 : vector<16x64xf32>
    %cst_64 = arith.constant 0.797884583 : f32
    %151 = vector.broadcast %cst_64 : f32 to vector<16x64xf32>
    %152 = arith.mulf %151, %150 : vector<16x64xf32>
    %153 = math.tanh %152 : vector<16x64xf32>
    %cst_65 = arith.constant 1.000000e+00 : f32
    %154 = vector.broadcast %cst_65 : f32 to vector<16x64xf32>
    %155 = arith.addf %154, %153 : vector<16x64xf32>
    %cst_66 = arith.constant 5.000000e-01 : f32
    %156 = vector.broadcast %cst_66 : f32 to vector<16x64xf32>
    %157 = arith.mulf %156, %155 : vector<16x64xf32>
    %158 = arith.mulf %145, %157 : vector<16x64xf32>
    %159 = arith.truncf %158 : vector<16x64xf32> to vector<16x64xbf16>
    %c0_67 = arith.constant 0 : index
    %c0_68 = arith.constant 0 : index
    %c0_69 = arith.constant 0 : index
    %160 = vector.load %arg15[%c0_67, %c0_68, %c0_69] : memref<2x64x32xbf16, #tpu.memory_space<vmem>>, vector<1x64x32xbf16>
    %161 = vector.shape_cast %160 : vector<1x64x32xbf16> to vector<64x32xbf16>
    %cst_70 = arith.constant dense<0.000000e+00> : vector<16x32xf32>
    %162 = tpu.matmul %159, %161, %cst_70 {dimension_numbers = #tpu.dot_dimension_numbers<[1], [0], [0], [1], [0, 0, 1, 1], [], []>} : vector<16x64xbf16>, vector<64x32xbf16>, vector<16x32xf32> -> vector<16x32xf32>
    %c0_71 = arith.constant 0 : index
    %c0_72 = arith.constant 0 : index
    %c0_73 = arith.constant 0 : index
    %163 = vector.load %arg16[%c0_71, %c0_72, %c0_73] : memref<2x1x32xf32, #tpu.memory_space<vmem>>, vector<1x1x32xf32>
    %164 = vector.shape_cast %163 : vector<1x1x32xf32> to vector<1x32xf32>
    %165 = vector.broadcast %164 : vector<1x32xf32> to vector<16x32xf32>
    %166 = arith.addf %162, %165 : vector<16x32xf32>
    %167 = arith.addf %137, %166 : vector<16x32xf32>
    %c0_74 = arith.constant 0 : index
    %c0_75 = arith.constant 0 : index
    %c0_76 = arith.constant 0 : index
    %168 = vector.load %arg17[%c0_74, %c0_75, %c0_76] : memref<2x1x32xf32, #tpu.memory_space<vmem>>, vector<1x1x32xf32>
    %169 = vector.shape_cast %168 : vector<1x1x32xf32> to vector<1x32xf32>
    %c0_77 = arith.constant 0 : index
    %c0_78 = arith.constant 0 : index
    %c0_79 = arith.constant 0 : index
    %170 = vector.load %arg18[%c0_77, %c0_78, %c0_79] : memref<2x1x32xf32, #tpu.memory_space<vmem>>, vector<1x1x32xf32>
    %171 = vector.shape_cast %170 : vector<1x1x32xf32> to vector<1x32xf32>
    %cst_80 = arith.constant dense<0.000000e+00> : vector<16xf32>
    %172 = vector.multi_reduction <add>, %167, %cst_80 [1] : vector<16x32xf32> to vector<16xf32>
    %173 = vector.shape_cast %172 : vector<16xf32> to vector<16x1xf32>
    %cst_81 = arith.constant 3.200000e+01 : f32
    %174 = vector.broadcast %cst_81 : f32 to vector<16x1xf32>
    %175 = arith.divf %173, %174 : vector<16x1xf32>
    %176 = vector.broadcast %175 : vector<16x1xf32> to vector<16x32xf32>
    %177 = arith.subf %167, %176 : vector<16x32xf32>
    %178 = arith.mulf %177, %177 : vector<16x32xf32>
    %cst_82 = arith.constant dense<0.000000e+00> : vector<16xf32>
    %179 = vector.multi_reduction <add>, %178, %cst_82 [1] : vector<16x32xf32> to vector<16xf32>
    %180 = vector.shape_cast %179 : vector<16xf32> to vector<16x1xf32>
    %cst_83 = arith.constant 3.200000e+01 : f32
    %181 = vector.broadcast %cst_83 : f32 to vector<16x1xf32>
    %182 = arith.divf %180, %181 : vector<16x1xf32>
    %cst_84 = arith.constant 9.99999996E-13 : f32
    %183 = vector.broadcast %cst_84 : f32 to vector<16x1xf32>
    %184 = arith.addf %182, %183 : vector<16x1xf32>
    %185 = math.rsqrt %184 : vector<16x1xf32>
    %186 = vector.broadcast %185 : vector<16x1xf32> to vector<16x32xf32>
    %187 = arith.mulf %177, %186 : vector<16x32xf32>
    %188 = vector.broadcast %169 : vector<1x32xf32> to vector<16x32xf32>
    %189 = arith.mulf %187, %188 : vector<16x32xf32>
    %190 = vector.broadcast %171 : vector<1x32xf32> to vector<16x32xf32>
    %191 = arith.addf %189, %190 : vector<16x32xf32>
    %192 = arith.truncf %191 : vector<16x32xf32> to vector<16x32xbf16>
    %c1 = arith.constant 1 : index
    %c0_85 = arith.constant 0 : index
    %c0_86 = arith.constant 0 : index
    %193 = vector.load %arg7[%c1, %c0_85, %c0_86] : memref<2x32x96xbf16, #tpu.memory_space<vmem>>, vector<1x32x96xbf16>
    %194 = vector.shape_cast %193 : vector<1x32x96xbf16> to vector<32x96xbf16>
    %cst_87 = arith.constant dense<0.000000e+00> : vector<16x96xf32>
    %195 = tpu.matmul %192, %194, %cst_87 {dimension_numbers = #tpu.dot_dimension_numbers<[1], [0], [0], [1], [0, 0, 1, 1], [], []>} : vector<16x32xbf16>, vector<32x96xbf16>, vector<16x96xf32> -> vector<16x96xf32>
    %c1_88 = arith.constant 1 : index
    %c0_89 = arith.constant 0 : index
    %c0_90 = arith.constant 0 : index
    %196 = vector.load %arg8[%c1_88, %c0_89, %c0_90] : memref<2x1x96xf32, #tpu.memory_space<vmem>>, vector<1x1x96xf32>
    %197 = vector.shape_cast %196 : vector<1x1x96xf32> to vector<1x96xf32>
    %198 = vector.broadcast %197 : vector<1x96xf32> to vector<16x96xf32>
    %199 = arith.addf %195, %198 : vector<16x96xf32>
    %200 = vector.shape_cast %199 : vector<16x96xf32> to vector<2x8x96xf32>
    %201 = vector.extract_strided_slice %200 {offsets = [0, 0, 0], sizes = [2, 8, 16], strides = [1, 1, 1]} : vector<2x8x96xf32> to vector<2x8x16xf32>
    %202 = arith.truncf %201 : vector<2x8x16xf32> to vector<2x8x16xbf16>
    %203 = vector.extract_strided_slice %200 {offsets = [0, 0, 32], sizes = [2, 8, 16], strides = [1, 1, 1]} : vector<2x8x96xf32> to vector<2x8x16xf32>
    %204 = arith.truncf %203 : vector<2x8x16xf32> to vector<2x8x16xbf16>
    %205 = vector.extract_strided_slice %200 {offsets = [0, 0, 64], sizes = [2, 8, 16], strides = [1, 1, 1]} : vector<2x8x96xf32> to vector<2x8x16xf32>
    %206 = arith.truncf %205 : vector<2x8x16xf32> to vector<2x8x16xbf16>
    "tpu.trace_start"() <{level = 10 : i32, message = "bqd,bkd->bqk"}> : () -> ()
    %cst_91 = arith.constant dense<0.000000e+00> : vector<2x8x8xf32>
    %207 = tpu.matmul %202, %204, %cst_91 {dimension_numbers = #tpu.dot_dimension_numbers<[2], [2], [1], [1], [0, 0, 0, 1, 1, 1], [0], [0]>} : vector<2x8x16xbf16>, vector<2x8x16xbf16>, vector<2x8x8xf32> -> vector<2x8x8xf32>
    "tpu.trace_stop"() : () -> ()
    %cst_92 = arith.constant 2.500000e-01 : f32
    %208 = vector.broadcast %cst_92 : f32 to vector<2x8x8xf32>
    %209 = arith.mulf %207, %208 : vector<2x8x8xf32>
    %210 = arith.addf %209, %49 : vector<2x8x8xf32>
    %cst_93 = arith.constant dense<0xFF800000> : vector<2x8xf32>
    %211 = vector.multi_reduction <maximumf>, %210, %cst_93 [2] : vector<2x8x8xf32> to vector<2x8xf32>
    %212 = vector.shape_cast %211 : vector<2x8xf32> to vector<2x8x1xf32>
    %213 = vector.broadcast %212 : vector<2x8x1xf32> to vector<2x8x8xf32>
    %214 = arith.subf %210, %213 : vector<2x8x8xf32>
    %215 = math.exp %214 : vector<2x8x8xf32>
    %cst_94 = arith.constant dense<0.000000e+00> : vector<2x8xf32>
    %216 = vector.multi_reduction <add>, %215, %cst_94 [2] : vector<2x8x8xf32> to vector<2x8xf32>
    %217 = vector.shape_cast %216 : vector<2x8xf32> to vector<2x8x1xf32>
    %218 = tpu.reciprocal %217 {approx = true} : vector<2x8x1xf32> -> vector<2x8x1xf32>
    %219 = vector.broadcast %218 : vector<2x8x1xf32> to vector<2x8x8xf32>
    %220 = arith.mulf %215, %219 : vector<2x8x8xf32>
    %221 = arith.truncf %220 : vector<2x8x8xf32> to vector<2x8x8xbf16>
    "tpu.trace_start"() <{level = 10 : i32, message = "bqk,bkd->bqd"}> : () -> ()
    %cst_95 = arith.constant dense<0.000000e+00> : vector<2x8x16xf32>
    %222 = tpu.matmul %221, %206, %cst_95 {dimension_numbers = #tpu.dot_dimension_numbers<[2], [1], [1], [2], [0, 0, 0, 1, 1, 2], [0], [0]>} : vector<2x8x8xbf16>, vector<2x8x16xbf16>, vector<2x8x16xf32> -> vector<2x8x16xf32>
    "tpu.trace_stop"() : () -> ()
    %223 = vector.extract_strided_slice %200 {offsets = [0, 0, 16], sizes = [2, 8, 16], strides = [1, 1, 1]} : vector<2x8x96xf32> to vector<2x8x16xf32>
    %224 = arith.truncf %223 : vector<2x8x16xf32> to vector<2x8x16xbf16>
    %225 = vector.extract_strided_slice %200 {offsets = [0, 0, 48], sizes = [2, 8, 16], strides = [1, 1, 1]} : vector<2x8x96xf32> to vector<2x8x16xf32>
    %226 = arith.truncf %225 : vector<2x8x16xf32> to vector<2x8x16xbf16>
    %227 = vector.extract_strided_slice %200 {offsets = [0, 0, 80], sizes = [2, 8, 16], strides = [1, 1, 1]} : vector<2x8x96xf32> to vector<2x8x16xf32>
    %228 = arith.truncf %227 : vector<2x8x16xf32> to vector<2x8x16xbf16>
    "tpu.trace_start"() <{level = 10 : i32, message = "bqd,bkd->bqk"}> : () -> ()
    %cst_96 = arith.constant dense<0.000000e+00> : vector<2x8x8xf32>
    %229 = tpu.matmul %224, %226, %cst_96 {dimension_numbers = #tpu.dot_dimension_numbers<[2], [2], [1], [1], [0, 0, 0, 1, 1, 1], [0], [0]>} : vector<2x8x16xbf16>, vector<2x8x16xbf16>, vector<2x8x8xf32> -> vector<2x8x8xf32>
    "tpu.trace_stop"() : () -> ()
    %cst_97 = arith.constant 2.500000e-01 : f32
    %230 = vector.broadcast %cst_97 : f32 to vector<2x8x8xf32>
    %231 = arith.mulf %229, %230 : vector<2x8x8xf32>
    %232 = arith.addf %231, %49 : vector<2x8x8xf32>
    %cst_98 = arith.constant dense<0xFF800000> : vector<2x8xf32>
    %233 = vector.multi_reduction <maximumf>, %232, %cst_98 [2] : vector<2x8x8xf32> to vector<2x8xf32>
    %234 = vector.shape_cast %233 : vector<2x8xf32> to vector<2x8x1xf32>
    %235 = vector.broadcast %234 : vector<2x8x1xf32> to vector<2x8x8xf32>
    %236 = arith.subf %232, %235 : vector<2x8x8xf32>
    %237 = math.exp %236 : vector<2x8x8xf32>
    %cst_99 = arith.constant dense<0.000000e+00> : vector<2x8xf32>
    %238 = vector.multi_reduction <add>, %237, %cst_99 [2] : vector<2x8x8xf32> to vector<2x8xf32>
    %239 = vector.shape_cast %238 : vector<2x8xf32> to vector<2x8x1xf32>
    %240 = tpu.reciprocal %239 {approx = true} : vector<2x8x1xf32> -> vector<2x8x1xf32>
    %241 = vector.broadcast %240 : vector<2x8x1xf32> to vector<2x8x8xf32>
    %242 = arith.mulf %237, %241 : vector<2x8x8xf32>
    %243 = arith.truncf %242 : vector<2x8x8xf32> to vector<2x8x8xbf16>
    "tpu.trace_start"() <{level = 10 : i32, message = "bqk,bkd->bqd"}> : () -> ()
    %cst_100 = arith.constant dense<0.000000e+00> : vector<2x8x16xf32>
    %244 = tpu.matmul %243, %228, %cst_100 {dimension_numbers = #tpu.dot_dimension_numbers<[2], [1], [1], [2], [0, 0, 0, 1, 1, 2], [0], [0]>} : vector<2x8x8xbf16>, vector<2x8x16xbf16>, vector<2x8x16xf32> -> vector<2x8x16xf32>
    "tpu.trace_stop"() : () -> ()
    %245 = tpu.concatenate %222, %244 in 2 : vector<2x8x16xf32>, vector<2x8x16xf32> -> vector<2x8x32xf32>
    %246 = vector.shape_cast %245 : vector<2x8x32xf32> to vector<16x32xf32>
    %247 = arith.truncf %246 : vector<16x32xf32> to vector<16x32xbf16>
    %c1_101 = arith.constant 1 : index
    %c0_102 = arith.constant 0 : index
    %c0_103 = arith.constant 0 : index
    %248 = vector.load %arg9[%c1_101, %c0_102, %c0_103] : memref<2x32x32xbf16, #tpu.memory_space<vmem>>, vector<1x32x32xbf16>
    %249 = vector.shape_cast %248 : vector<1x32x32xbf16> to vector<32x32xbf16>
    %cst_104 = arith.constant dense<0.000000e+00> : vector<16x32xf32>
    %250 = tpu.matmul %247, %249, %cst_104 {dimension_numbers = #tpu.dot_dimension_numbers<[1], [0], [0], [1], [0, 0, 1, 1], [], []>} : vector<16x32xbf16>, vector<32x32xbf16>, vector<16x32xf32> -> vector<16x32xf32>
    %c1_105 = arith.constant 1 : index
    %c0_106 = arith.constant 0 : index
    %c0_107 = arith.constant 0 : index
    %251 = vector.load %arg10[%c1_105, %c0_106, %c0_107] : memref<2x1x32xf32, #tpu.memory_space<vmem>>, vector<1x1x32xf32>
    %252 = vector.shape_cast %251 : vector<1x1x32xf32> to vector<1x32xf32>
    %253 = vector.broadcast %252 : vector<1x32xf32> to vector<16x32xf32>
    %254 = arith.addf %250, %253 : vector<16x32xf32>
    %255 = arith.addf %191, %254 : vector<16x32xf32>
    %c1_108 = arith.constant 1 : index
    %c0_109 = arith.constant 0 : index
    %c0_110 = arith.constant 0 : index
    %256 = vector.load %arg11[%c1_108, %c0_109, %c0_110] : memref<2x1x32xf32, #tpu.memory_space<vmem>>, vector<1x1x32xf32>
    %257 = vector.shape_cast %256 : vector<1x1x32xf32> to vector<1x32xf32>
    %c1_111 = arith.constant 1 : index
    %c0_112 = arith.constant 0 : index
    %c0_113 = arith.constant 0 : index
    %258 = vector.load %arg12[%c1_111, %c0_112, %c0_113] : memref<2x1x32xf32, #tpu.memory_space<vmem>>, vector<1x1x32xf32>
    %259 = vector.shape_cast %258 : vector<1x1x32xf32> to vector<1x32xf32>
    %cst_114 = arith.constant dense<0.000000e+00> : vector<16xf32>
    %260 = vector.multi_reduction <add>, %255, %cst_114 [1] : vector<16x32xf32> to vector<16xf32>
    %261 = vector.shape_cast %260 : vector<16xf32> to vector<16x1xf32>
    %cst_115 = arith.constant 3.200000e+01 : f32
    %262 = vector.broadcast %cst_115 : f32 to vector<16x1xf32>
    %263 = arith.divf %261, %262 : vector<16x1xf32>
    %264 = vector.broadcast %263 : vector<16x1xf32> to vector<16x32xf32>
    %265 = arith.subf %255, %264 : vector<16x32xf32>
    %266 = arith.mulf %265, %265 : vector<16x32xf32>
    %cst_116 = arith.constant dense<0.000000e+00> : vector<16xf32>
    %267 = vector.multi_reduction <add>, %266, %cst_116 [1] : vector<16x32xf32> to vector<16xf32>
    %268 = vector.shape_cast %267 : vector<16xf32> to vector<16x1xf32>
    %cst_117 = arith.constant 3.200000e+01 : f32
    %269 = vector.broadcast %cst_117 : f32 to vector<16x1xf32>
    %270 = arith.divf %268, %269 : vector<16x1xf32>
    %cst_118 = arith.constant 9.99999996E-13 : f32
    %271 = vector.broadcast %cst_118 : f32 to vector<16x1xf32>
    %272 = arith.addf %270, %271 : vector<16x1xf32>
    %273 = math.rsqrt %272 : vector<16x1xf32>
    %274 = vector.broadcast %273 : vector<16x1xf32> to vector<16x32xf32>
    %275 = arith.mulf %265, %274 : vector<16x32xf32>
    %276 = vector.broadcast %257 : vector<1x32xf32> to vector<16x32xf32>
    %277 = arith.mulf %275, %276 : vector<16x32xf32>
    %278 = vector.broadcast %259 : vector<1x32xf32> to vector<16x32xf32>
    %279 = arith.addf %277, %278 : vector<16x32xf32>
    %280 = arith.truncf %279 : vector<16x32xf32> to vector<16x32xbf16>
    %c1_119 = arith.constant 1 : index
    %c0_120 = arith.constant 0 : index
    %c0_121 = arith.constant 0 : index
    %281 = vector.load %arg13[%c1_119, %c0_120, %c0_121] : memref<2x32x64xbf16, #tpu.memory_space<vmem>>, vector<1x32x64xbf16>
    %282 = vector.shape_cast %281 : vector<1x32x64xbf16> to vector<32x64xbf16>
    %cst_122 = arith.constant dense<0.000000e+00> : vector<16x64xf32>
    %283 = tpu.matmul %280, %282, %cst_122 {dimension_numbers = #tpu.dot_dimension_numbers<[1], [0], [0], [1], [0, 0, 1, 1], [], []>} : vector<16x32xbf16>, vector<32x64xbf16>, vector<16x64xf32> -> vector<16x64xf32>
    %c1_123 = arith.constant 1 : index
    %c0_124 = arith.constant 0 : index
    %c0_125 = arith.constant 0 : index
    %284 = vector.load %arg14[%c1_123, %c0_124, %c0_125] : memref<2x1x64xf32, #tpu.memory_space<vmem>>, vector<1x1x64xf32>
    %285 = vector.shape_cast %284 : vector<1x1x64xf32> to vector<1x64xf32>
    %286 = vector.broadcast %285 : vector<1x64xf32> to vector<16x64xf32>
    %287 = arith.addf %283, %286 : vector<16x64xf32>
    %288 = arith.mulf %287, %287 : vector<16x64xf32>
    %289 = arith.mulf %287, %288 : vector<16x64xf32>
    %cst_126 = arith.constant 4.471500e-02 : f32
    %290 = vector.broadcast %cst_126 : f32 to vector<16x64xf32>
    %291 = arith.mulf %290, %289 : vector<16x64xf32>
    %292 = arith.addf %287, %291 : vector<16x64xf32>
    %cst_127 = arith.constant 0.797884583 : f32
    %293 = vector.broadcast %cst_127 : f32 to vector<16x64xf32>
    %294 = arith.mulf %293, %292 : vector<16x64xf32>
    %295 = math.tanh %294 : vector<16x64xf32>
    %cst_128 = arith.constant 1.000000e+00 : f32
    %296 = vector.broadcast %cst_128 : f32 to vector<16x64xf32>
    %297 = arith.addf %296, %295 : vector<16x64xf32>
    %cst_129 = arith.constant 5.000000e-01 : f32
    %298 = vector.broadcast %cst_129 : f32 to vector<16x64xf32>
    %299 = arith.mulf %298, %297 : vector<16x64xf32>
    %300 = arith.mulf %287, %299 : vector<16x64xf32>
    %301 = arith.truncf %300 : vector<16x64xf32> to vector<16x64xbf16>
    %c1_130 = arith.constant 1 : index
    %c0_131 = arith.constant 0 : index
    %c0_132 = arith.constant 0 : index
    %302 = vector.load %arg15[%c1_130, %c0_131, %c0_132] : memref<2x64x32xbf16, #tpu.memory_space<vmem>>, vector<1x64x32xbf16>
    %303 = vector.shape_cast %302 : vector<1x64x32xbf16> to vector<64x32xbf16>
    %cst_133 = arith.constant dense<0.000000e+00> : vector<16x32xf32>
    %304 = tpu.matmul %301, %303, %cst_133 {dimension_numbers = #tpu.dot_dimension_numbers<[1], [0], [0], [1], [0, 0, 1, 1], [], []>} : vector<16x64xbf16>, vector<64x32xbf16>, vector<16x32xf32> -> vector<16x32xf32>
    %c1_134 = arith.constant 1 : index
    %c0_135 = arith.constant 0 : index
    %c0_136 = arith.constant 0 : index
    %305 = vector.load %arg16[%c1_134, %c0_135, %c0_136] : memref<2x1x32xf32, #tpu.memory_space<vmem>>, vector<1x1x32xf32>
    %306 = vector.shape_cast %305 : vector<1x1x32xf32> to vector<1x32xf32>
    %307 = vector.broadcast %306 : vector<1x32xf32> to vector<16x32xf32>
    %308 = arith.addf %304, %307 : vector<16x32xf32>
    %309 = arith.addf %279, %308 : vector<16x32xf32>
    %c1_137 = arith.constant 1 : index
    %c0_138 = arith.constant 0 : index
    %c0_139 = arith.constant 0 : index
    %310 = vector.load %arg17[%c1_137, %c0_138, %c0_139] : memref<2x1x32xf32, #tpu.memory_space<vmem>>, vector<1x1x32xf32>
    %311 = vector.shape_cast %310 : vector<1x1x32xf32> to vector<1x32xf32>
    %c1_140 = arith.constant 1 : index
    %c0_141 = arith.constant 0 : index
    %c0_142 = arith.constant 0 : index
    %312 = vector.load %arg18[%c1_140, %c0_141, %c0_142] : memref<2x1x32xf32, #tpu.memory_space<vmem>>, vector<1x1x32xf32>
    %313 = vector.shape_cast %312 : vector<1x1x32xf32> to vector<1x32xf32>
    %cst_143 = arith.constant dense<0.000000e+00> : vector<16xf32>
    %314 = vector.multi_reduction <add>, %309, %cst_143 [1] : vector<16x32xf32> to vector<16xf32>
    %315 = vector.shape_cast %314 : vector<16xf32> to vector<16x1xf32>
    %cst_144 = arith.constant 3.200000e+01 : f32
    %316 = vector.broadcast %cst_144 : f32 to vector<16x1xf32>
    %317 = arith.divf %315, %316 : vector<16x1xf32>
    %318 = vector.broadcast %317 : vector<16x1xf32> to vector<16x32xf32>
    %319 = arith.subf %309, %318 : vector<16x32xf32>
    %320 = arith.mulf %319, %319 : vector<16x32xf32>
    %cst_145 = arith.constant dense<0.000000e+00> : vector<16xf32>
    %321 = vector.multi_reduction <add>, %320, %cst_145 [1] : vector<16x32xf32> to vector<16xf32>
    %322 = vector.shape_cast %321 : vector<16xf32> to vector<16x1xf32>
    %cst_146 = arith.constant 3.200000e+01 : f32
    %323 = vector.broadcast %cst_146 : f32 to vector<16x1xf32>
    %324 = arith.divf %322, %323 : vector<16x1xf32>
    %cst_147 = arith.constant 9.99999996E-13 : f32
    %325 = vector.broadcast %cst_147 : f32 to vector<16x1xf32>
    %326 = arith.addf %324, %325 : vector<16x1xf32>
    %327 = math.rsqrt %326 : vector<16x1xf32>
    %328 = vector.broadcast %327 : vector<16x1xf32> to vector<16x32xf32>
    %329 = arith.mulf %319, %328 : vector<16x32xf32>
    %330 = vector.broadcast %311 : vector<1x32xf32> to vector<16x32xf32>
    %331 = arith.mulf %329, %330 : vector<16x32xf32>
    %332 = vector.broadcast %313 : vector<1x32xf32> to vector<16x32xf32>
    %333 = arith.addf %331, %332 : vector<16x32xf32>
    %334 = arith.truncf %333 : vector<16x32xf32> to vector<16x32xbf16>
    %c0_148 = arith.constant 0 : index
    %c0_149 = arith.constant 0 : index
    %335 = vector.load %arg19[%c0_148, %c0_149] : memref<32x128xbf16, #tpu.memory_space<vmem>>, vector<32x128xbf16>
    %cst_150 = arith.constant dense<0.000000e+00> : vector<16x128xf32>
    %336 = tpu.matmul %334, %335, %cst_150 {dimension_numbers = #tpu.dot_dimension_numbers<[1], [0], [0], [1], [0, 0, 1, 1], [], []>} : vector<16x32xbf16>, vector<32x128xbf16>, vector<16x128xf32> -> vector<16x128xf32>
    %c0_151 = arith.constant 0 : index
    %c0_152 = arith.constant 0 : index
    %337 = vector.load %arg20[%c0_151, %c0_152] : memref<1x128xf32, #tpu.memory_space<vmem>>, vector<1x128xf32>
    %338 = vector.broadcast %337 : vector<1x128xf32> to vector<16x128xf32>
    %339 = arith.addf %336, %338 : vector<16x128xf32>
    %340 = vector.shape_cast %339 : vector<16x128xf32> to vector<2x8x128xf32>
    %c0_153 = arith.constant 0 : index
    %c0_154 = arith.constant 0 : index
    %c0_155 = arith.constant 0 : index
    %341 = vector.load %arg21[%c0_153, %c0_154, %c0_155] : memref<2x8x128xf32, #tpu.memory_space<vmem>>, vector<2x8x128xf32>
    tpu.vector_store %arg21[%c0_153, %c0_154, %c0_155], %340 {strides = array<i32>} : memref<2x8x128xf32, #tpu.memory_space<vmem>>, vector<2x8x128xf32>,
    return
  }
  func.func @transform_0(%arg0: i32) -> (i32, i32, i32) {
    %c0_i32 = arith.constant 0 : i32
    %c0_i32_0 = arith.constant 0 : i32
    %c0_i32_1 = arith.constant 0 : i32
    return %arg0, %c0_i32, %c0_i32_0 : i32, i32, i32
  }
  func.func @transform_1(%arg0: i32) -> (i32, i32, i32) {
    %c0_i32 = arith.constant 0 : i32
    %c0_i32_0 = arith.constant 0 : i32
    %c0_i32_1 = arith.constant 0 : i32
    return %arg0, %c0_i32, %c0_i32_0 : i32, i32, i32
  }
  func.func @transform_2(%arg0: i32) -> (i32, i32, i32) {
    %c0_i32 = arith.constant 0 : i32
    %c0_i32_0 = arith.constant 0 : i32
    %c0_i32_1 = arith.constant 0 : i32
    return %arg0, %c0_i32, %c0_i32_0 : i32, i32, i32
  }
  func.func @transform_3(%arg0: i32) -> (i32, i32) {
    %c0_i32 = arith.constant 0 : i32
    %c0_i32_0 = arith.constant 0 : i32
    %c0_i32_1 = arith.constant 0 : i32
    return %c0_i32, %c0_i32_0 : i32, i32
  }
  func.func @transform_4(%arg0: i32) -> (i32, i32) {
    %c0_i32 = arith.constant 0 : i32
    %c0_i32_0 = arith.constant 0 : i32
    %c0_i32_1 = arith.constant 0 : i32
    return %c0_i32, %c0_i32_0 : i32, i32
  }
  func.func @transform_5(%arg0: i32) -> (i32, i32) {
    %c0_i32 = arith.constant 0 : i32
    %c0_i32_0 = arith.constant 0 : i32
    %c0_i32_1 = arith.constant 0 : i32
    return %c0_i32, %c0_i32_0 : i32, i32
  }
  func.func @transform_6(%arg0: i32) -> (i32, i32, i32) {
    %c0_i32 = arith.constant 0 : i32
    %c0_i32_0 = arith.constant 0 : i32
    %c0_i32_1 = arith.constant 0 : i32
    %c0_i32_2 = arith.constant 0 : i32
    return %c0_i32, %c0_i32_0, %c0_i32_1 : i32, i32, i32
  }
  func.func @transform_7(%arg0: i32) -> (i32, i32, i32) {
    %c0_i32 = arith.constant 0 : i32
    %c0_i32_0 = arith.constant 0 : i32
    %c0_i32_1 = arith.constant 0 : i32
    %c0_i32_2 = arith.constant 0 : i32
    return %c0_i32, %c0_i32_0, %c0_i32_1 : i32, i32, i32
  }
  func.func @transform_8(%arg0: i32) -> (i32, i32, i32) {
    %c0_i32 = arith.constant 0 : i32
    %c0_i32_0 = arith.constant 0 : i32
    %c0_i32_1 = arith.constant 0 : i32
    %c0_i32_2 = arith.constant 0 : i32
    return %c0_i32, %c0_i32_0, %c0_i32_1 : i32, i32, i32
  }
  func.func @transform_9(%arg0: i32) -> (i32, i32, i32) {
    %c0_i32 = arith.constant 0 : i32
    %c0_i32_0 = arith.constant 0 : i32
    %c0_i32_1 = arith.constant 0 : i32
    %c0_i32_2 = arith.constant 0 : i32
    return %c0_i32, %c0_i32_0, %c0_i32_1 : i32, i32, i32
  }
  func.func @transform_10(%arg0: i32) -> (i32, i32, i32) {
    %c0_i32 = arith.constant 0 : i32
    %c0_i32_0 = arith.constant 0 : i32
    %c0_i32_1 = arith.constant 0 : i32
    %c0_i32_2 = arith.constant 0 : i32
    return %c0_i32, %c0_i32_0, %c0_i32_1 : i32, i32, i32
  }
  func.func @transform_11(%arg0: i32) -> (i32, i32, i32) {
    %c0_i32 = arith.constant 0 : i32
    %c0_i32_0 = arith.constant 0 : i32
    %c0_i32_1 = arith.constant 0 : i32
    %c0_i32_2 = arith.constant 0 : i32
    return %c0_i32, %c0_i32_0, %c0_i32_1 : i32, i32, i32
  }
  func.func @transform_12(%arg0: i32) -> (i32, i32, i32) {
    %c0_i32 = arith.constant 0 : i32
    %c0_i32_0 = arith.constant 0 : i32
    %c0_i32_1 = arith.constant 0 : i32
    %c0_i32_2 = arith.constant 0 : i32
    return %c0_i32, %c0_i32_0, %c0_i32_1 : i32, i32, i32
  }
  func.func @transform_13(%arg0: i32) -> (i32, i32, i32) {
    %c0_i32 = arith.constant 0 : i32
    %c0_i32_0 = arith.constant 0 : i32
    %c0_i32_1 = arith.constant 0 : i32
    %c0_i32_2 = arith.constant 0 : i32
    return %c0_i32, %c0_i32_0, %c0_i32_1 : i32, i32, i32
  }
  func.func @transform_14(%arg0: i32) -> (i32, i32, i32) {
    %c0_i32 = arith.constant 0 : i32
    %c0_i32_0 = arith.constant 0 : i32
    %c0_i32_1 = arith.constant 0 : i32
    %c0_i32_2 = arith.constant 0 : i32
    return %c0_i32, %c0_i32_0, %c0_i32_1 : i32, i32, i32
  }
  func.func @transform_15(%arg0: i32) -> (i32, i32, i32) {
    %c0_i32 = arith.constant 0 : i32
    %c0_i32_0 = arith.constant 0 : i32
    %c0_i32_1 = arith.constant 0 : i32
    %c0_i32_2 = arith.constant 0 : i32
    return %c0_i32, %c0_i32_0, %c0_i32_1 : i32, i32, i32
  }
  func.func @transform_16(%arg0: i32) -> (i32, i32, i32) {
    %c0_i32 = arith.constant 0 : i32
    %c0_i32_0 = arith.constant 0 : i32
    %c0_i32_1 = arith.constant 0 : i32
    %c0_i32_2 = arith.constant 0 : i32
    return %c0_i32, %c0_i32_0, %c0_i32_1 : i32, i32, i32
  }
  func.func @transform_17(%arg0: i32) -> (i32, i32, i32) {
    %c0_i32 = arith.constant 0 : i32
    %c0_i32_0 = arith.constant 0 : i32
    %c0_i32_1 = arith.constant 0 : i32
    %c0_i32_2 = arith.constant 0 : i32
    return %c0_i32, %c0_i32_0, %c0_i32_1 : i32, i32, i32
  }
  func.func @transform_18(%arg0: i32) -> (i32, i32) {
    %c0_i32 = arith.constant 0 : i32
    %c0_i32_0 = arith.constant 0 : i32
    %c0_i32_1 = arith.constant 0 : i32
    return %c0_i32, %c0_i32_0 : i32, i32
  }
  func.func @transform_19(%arg0: i32) -> (i32, i32) {
    %c0_i32 = arith.constant 0 : i32
    %c0_i32_0 = arith.constant 0 : i32
    %c0_i32_1 = arith.constant 0 : i32
    return %c0_i32, %c0_i32_0 : i32, i32
  }
  func.func @transform_20(%arg0: i32) -> (i32, i32, i32) {
    %c0_i32 = arith.constant 0 : i32
    %c0_i32_0 = arith.constant 0 : i32
    %c0_i32_1 = arith.constant 0 : i32
    return %arg0, %c0_i32, %c0_i32_0 : i32, i32, i32
  }
}

</mosaic_0001>

<bundles_post_ra>
// kernel: bert_encoder_net_forward.1
= control target key start
LH: loop header
LB: loop body
LE: loop exit
PB: predicated region body
PF: predicated region fallthrough
CT: control target
= control target key end

     0   :  { %s3258_s0 = inlined_call_operand.vmem [shape: s32[2,8,1], index: 0, kind: input, shape index: {}]   ;;  %s3259_s1 = inlined_call_operand.vmem [shape: s32[2,8,1], index: 1, kind: input, shape index: {}]   ;;  %s3260_s2 = inlined_call_operand.vmem [shape: s32[2,1,8], index: 2, kind: input, shape index: {}]   ;;  %s3261_s3 = inlined_call_operand.hbm [shape: f32[110,32], index: 3, kind: input, shape index: {}]   ;;  %s3262_s4 = inlined_call_operand.vmem [shape: f32[1,32], index: 4, kind: input, shape index: {}]   ;;  %s3263_s5 = inlined_call_operand.vmem [shape: f32[1,32], index: 5, kind: input, shape index: {}]   ;;  %s3264_s6 = inlined_call_operand.hbm [shape: bf16[2,32,96], index: 6, kind: input, shape index: {}]   ;;  %s3265_s7 = inlined_call_operand.vmem [shape: f32[2,1,96], index: 7, kind: input, shape index: {}]   ;;  %s3266_s8 = inlined_call_operand.hbm [shape: bf16[2,32,32], index: 8, kind: input, shape index: {}]   ;;  %s3267_s9 = inlined_call_operand.vmem [shape: f32[2,1,32], index: 9, kind: input, shape index: {}, may-alias: {9,11,15,17}]   ;;  %s3268_s10 = inlined_call_operand.vmem [shape: f32[2,1,32], index: 10, kind: input, shape index: {}, may-alias: {10,16}]   ;;  %s3269_s11 = inlined_call_operand.vmem [shape: f32[2,1,32], index: 11, kind: input, shape index: {}, may-alias: {9,11,15,17}]   ;;  %s3270_s12 = inlined_call_operand.vmem [shape: bf16[2,32,64], index: 12, kind: input, shape index: {}]   ;;  %s3271_s13 = inlined_call_operand.vmem [shape: f32[2,1,64], index: 13, kind: input, shape index: {}]   ;;  %s3272_s14 = inlined_call_operand.vmem [shape: bf16[2,64,32], index: 14, kind: input, shape index: {}]   ;;  %s3273_s15 = inlined_call_operand.vmem [shape: f32[2,1,32], index: 15, kind: input, shape index: {}, may-alias: {9,11,15,17}]   ;;  %s3274_s16 = inlined_call_operand.vmem [shape: f32[2,1,32], index: 16, kind: input, shape index: {}, may-alias: {10,16}]   ;;  %s3275_s17 = inlined_call_operand.vmem [shape: f32[2,1,32], index: 17, kind: input, shape index: {}, may-alias: {9,11,15,17}]   ;;  %s3276_s18 = inlined_call_operand.vmem [shape: bf16[32,128], index: 18, kind: input, shape index: {}]   ;;  %s3277_s19 = inlined_call_operand.vmem [shape: f32[1,128], index: 19, kind: input, shape index: {}]   ;;  %s3278_s20 = inlined_call_operand.vmem [shape: f32[2,8,128], index: 20, kind: output, shape index: {}]  }
   0x1   :  { %3286 = sst [smem:[#allocation9_spill]] %s3258_s0 }
   0x2   :  { %3287 = sst [smem:[#allocation10_spill]] %s3259_s1 }
   0x3   :  { %3288 = sst [smem:[#allocation11_spill]] %s3260_s2 }
   0x4   :  { %3289 = sst [smem:[#allocation12_spill]] %s3261_s3 }
   0x5   :  { %3290 = sst [smem:[#allocation13_spill]] %s3262_s4 }
   0x6   :  { %3291 = sst [smem:[#allocation14_spill]] %s3278_s20 }
   0x7   :  { %25 = vsyncpa [#allocation3], 0 }
   0x8   :  { %26 = vsyncpa [#allocation5], 0  ;;  %s2702_s1 = smov [#allocation4]   ;;  %s2632_s2 = scalar_lea.hbm %s3264_s6, 512 }
   0x9   :  { %s54_s22 = sshll.u32 %s2702_s1, 4  ;;  %p2633_p0 = scmp.ne.s32.totalorder %s3264_s6, %s2632_s2  ;;  %s55_s22 = int_to_ptr.vmem [resolvable:$true] %s54_s22 }
   0xa   :  { %p2636_p1 = scmp.lt.u32.totalorder %s2632_s2, %s3264_s6 }
   0xc   :  { %p2638_p2 = pnand %p2636_p1, %p2633_p0 }
   0xe   :  { %2641 = shalt.err (!%p2638_p2)
}
   0xf   :  { %s2642_s28 = scalar_lea.vmem %s55_s22, 512  ;;  %p2647_p4 = scmp.lt.s32.totalorder %s55_s22, %s55_s22 }
  0x10   :  { %p2643_p3 = scmp.ne.s32.totalorder %s55_s22, %s2642_s28  ;;  %p2648_p5 = scmp.lt.s32.totalorder %s2642_s28, %s2642_s28 }
  0x12   :  { %p2649_p6 = por %p2648_p5, %p2647_p4 }
  0x14   :  { %p2650_p7 = pnand %p2649_p6, %p2643_p3 }
  0x16   :  { %2653 = shalt.err (!%p2650_p7)
}
  0x17   :  { %s3284_s4 = smov 64   ;;  %s2704_s29 = smov 4  }
  0x18   :  { %60 = dma.hbm_to_vmem [thread:$0]  %s3264_s6, 512, %s55_s22, [#allocation5], %s3284_s4, %s3284_s4, %s2704_s29  }
  0x19   :  { %s2705_s21 = smov [#allocation2]   ;;  %s3292_s2 = sld [smem:[#allocation12_spill]] }
  0x1a   :  { %s38_s1 = sshll.u32 %s2705_s21, 4  ;;  %s39_s1 = int_to_ptr.vmem [resolvable:$true] %s38_s1 }
  0x1f   :  { %s2654_s25 = scalar_lea.hbm %s3292_s2, 1792 }
  0x20   :  { %p2655_p8 = scmp.ne.s32.totalorder %s3292_s2, %s2654_s25  ;;  %p2658_p9 = scmp.lt.u32.totalorder %s2654_s25, %s3292_s2 }
  0x22   :  { %p2660_p10 = pnand %p2658_p9, %p2655_p8 }
  0x24   :  { %2663 = shalt.err (!%p2660_p10)
}
  0x25   :  { %s2664_s20 = scalar_lea.vmem %s39_s1, 1792  ;;  %p2669_p12 = scmp.lt.s32.totalorder %s39_s1, %s39_s1 }
  0x26   :  { %p2665_p11 = scmp.ne.s32.totalorder %s39_s1, %s2664_s20  ;;  %p2670_p13 = scmp.lt.s32.totalorder %s2664_s20, %s2664_s20 }
  0x28   :  { %p2671_p0 = por %p2670_p13, %p2669_p12 }
  0x2a   :  { %p2672_p1 = pnand %p2671_p0, %p2665_p11 }
  0x2c   :  { %2675 = shalt.err (!%p2672_p1)
}
  0x2d   :  { %s2706_s6 = smov 128   ;;  %s2707_s22 = smov 8  }
  0x2e   :  { %44 = dma.hbm_to_vmem [thread:$0]  %s3292_s2, 1792, %s39_s1, [#allocation3], %s2706_s6, %s2706_s6, %s2707_s22  }
  0x2f   :  { %s2708_s21 = smov [#allocation6]   ;;  %s2676_s3 = scalar_lea.hbm %s3266_s8, 512 }
  0x30   :  { %s68_s23 = sshll.u32 %s2708_s21, 4  ;;  %p2677_p2 = scmp.ne.s32.totalorder %s3266_s8, %s2676_s3  ;;  %s69_s23 = int_to_ptr.vmem [resolvable:$true] %s68_s23 }
  0x31   :  { %p2680_p3 = scmp.lt.u32.totalorder %s2676_s3, %s3266_s8 }
  0x33   :  { %p2682_p4 = pnand %p2680_p3, %p2677_p2 }
  0x35   :  { %2685 = shalt.err (!%p2682_p4)
}
  0x36   :  { %s2686_s4 = scalar_lea.vmem %s69_s23, 512  ;;  %p2691_p6 = scmp.lt.s32.totalorder %s69_s23, %s69_s23 }
  0x37   :  { %p2687_p5 = scmp.ne.s32.totalorder %s69_s23, %s2686_s4  ;;  %p2692_p7 = scmp.lt.s32.totalorder %s2686_s4, %s2686_s4 }
  0x39   :  { %p2693_p8 = por %p2692_p7, %p2691_p6 }
  0x3b   :  { %p2694_p9 = pnand %p2693_p8, %p2687_p5 }
  0x3d   :  { %2697 = shalt.err (!%p2694_p9)
}
  0x3e   :  { %s3293_s1 = smov 64  }
  0x3f   :  { %74 = dma.hbm_to_vmem [thread:$0]  %s3266_s8, 512, %s69_s23, [#allocation5], %s3293_s1, %s3293_s1, %s2704_s29  }
  0x40   :  { %2698 = dma.done.wait [#allocation3], 1792  }
  0x41   :  { %2699 = vsyncadd [#allocation3], 4294965504 }
  0x42   :  { %2700 = dma.done.wait [#allocation5], 1024  }
  0x43   :  { %2701 = vsyncadd [#allocation5], 4294966272  ;;  %v2709_v0 = vmov 0   ;;  %s3294_s4 = sld [smem:[#allocation9_spill]]  ;;  %s3295_s3 = sld [smem:[#allocation10_spill]]  ;;  %v143_v6 = vld [vmem:[#allocation2] sm:$0xff]  ;;  %v111_v29 = vlaneseq }
  0x44   :  { %2539 = vset.pattern.permute.xlu1 %v2709_v0  ;;  %2538 = vset.pattern.permute.xlu0 %v2709_v0  ;;  %v144_v7 = vld [vmem:[#allocation2 + $0x8] sm:$0xff]  ;;  %v145_v10 = vld [vmem:[#allocation2 + $0x10] sm:$0xff]  ;;  %v146_v11 = vld [vmem:[#allocation2 + $0x18] sm:$0xff]  ;;  %v2710_v20 = vmov 0.0   ;;  %vm164_vm0 = vcmask 1045504   ;;  %vm2711_vm1 = vmmov 1  }
  0x45   :  { %v2492_v9 = vpack.c.bf16 %v144_v7, %v143_v6  ;;  %v2496_v12 = vpack.c.bf16 %v146_v11, %v145_v10  ;;  %v147_v13 = vld [vmem:[#allocation2 + $0x20] sm:$0xff]  ;;  %v148_v14 = vld [vmem:[#allocation2 + $0x28] sm:$0xff]  ;;  %v149_v15 = vld [vmem:[#allocation2 + $0x30] sm:$0xff]  ;;  %2316 = vmatprep.subr.bf16.mxu1 %v2710_v20  ;;  %v2880_v30 = vshrl.u32 %v111_v29, 7  ;;  %v112_v34 = vand.u32 127, %v111_v29  ;;  %s3296_s27 = sld [smem:[#allocation13_spill]] }
  0x46   :  { %v2500_v16 = vpack.c.bf16 %v148_v14, %v147_v13  ;;  %v150_v17 = vld [vmem:[#allocation2 + $0x38] sm:$0xff]  ;;  %v151_v18 = vld [vmem:[#allocation2 + $0x40] sm:$0xff]  ;;  %v152_v19 = vld [vmem:[#allocation2 + $0x48] sm:$0xff]  ;;  %vm157_vm11 = vcmask 900096   ;;  %vm245_vm13 = vcmask 261120   ;;  %vm2712_vm14 = vmmov 0  }
  0x47   :  { %2493 = vmatprep.subr.bf16.mxu0 %v2492_v9  ;;  %v2504_v21 = vpack.c.bf16 %v150_v17, %v149_v15  ;;  %v153_v22 = vld [vmem:[#allocation2 + $0x50] sm:$0xff]  ;;  %v154_v23 = vld [vmem:[#allocation2 + $0x58] sm:$0xff]  ;;  %v2508_v24 = vpack.c.bf16 %v152_v19, %v151_v18  ;;  %v155_v25 = vld [vmem:[#allocation2 + $0x60] sm:$0xff]  ;;  %v135_v33 = vadd.s32 102, %v2880_v30  ;;  %2320 = vmatprep.mubr.msk.bf16.mxu1 %vm2712_vm14, %v2710_v20  ;;  %vm382_vm15 = vcmask 130048   ;;  %s2714_s24 = smov 80  }
  0x48   :  { %2495 = vmatpush3.bf16.msra.mxu0 %v2492_v9  ;;  %v156_v26 = vld [vmem:[#allocation2 + $0x68] sm:$0x3f]  ;;  %v2512_v27 = vpack.c.bf16 %v154_v23, %v153_v22  ;;  %vm2517_vm2 = vmpackc.low %vm164_vm0, %vm2711_vm1  ;;  %v2550_v53 = vld [vmem:[#allocation4] sm:$0xff]   ;;  %vm482_vm0 = vcmask 64512   ;;  %vm512_vm1 = vcmask 1043456   ;;  %s2715_s25 = smov 112  }
  0x49   :  { %v108_v1 = vld [vmem:[%s3294_s4 + $0x8] sm:$0xff]  ;;  %v107_v2 = vld [vmem:[%s3294_s4] sm:$0xff]  ;;  %2497 = vmatprep.subr.bf16.mxu0 %v2496_v12  ;;  %v2516_v28 = vpack.c.bf16 %v156_v26, %v155_v25  ;;  %vm136_vm3 = vcmp.eq.s32.totalorder %v112_v34, %v135_v33  ;;  %2317 = vmatpush3.bf16.msra.mxu1 %v2550_v53  ;;  %v2551_v54 = vld [vmem:[#allocation4 + $0x8] sm:$0xff]   ;;  %s3297_s4 = sld [smem:[#allocation11_spill]]  ;;  %v301_v26 = vsub.s32 0, %v2880_v30  ;;  %s2717_s8 = smov 16  }
  0x4a   :  { %v110_v3 = vld [vmem:[%s3295_s3 + $0x8] sm:$0xff]  ;;  %119 = vperm.xlu1 %2539, %v108_v1   ;;  %116 = vperm.xlu0 %2538, %v107_v2   ;;  %v109_v5 = vld [vmem:[%s3295_s3] sm:$0xff]  ;;  %s2716_s3 = smov 48  }
  0x4b   :  { %v124_v4 = vadd.s32 100, %v110_v3  ;;  %v123_v8 = vadd.s32 100, %v109_v5  ;;  %2318 = vmatprep.subr.bf16.mxu1 %v2710_v20  ;;  %v2118_v63 = vld [vmem:[%s3296_s27] ss:$0 sm:$0xff] }
  0x4c   :  { %2499 = vmatpush3.bf16.msra.mxu0 %v2496_v12  ;;  %v2119_v3 = vld [vmem:[%s3263_s5] ss:$0 sm:$0xff]  ;;  %s2713_s5 = smov 96  }
  0x4d   :  { %2501 = vmatprep.subr.bf16.mxu0 %v2500_v16  ;;  %2319 = vmatpush3.bf16.msra.mxu1 %v2551_v54 }
  0x4e   :  { %129 = vperm.xlu1 %2539, %v124_v4   ;;  %126 = vperm.xlu0 %2538, %v123_v8   ;;  %v2122_v8 = vld [vmem:[%s3265_s7] ss:$0 sm:$0xff] }
  0x4f   :  { %2324 = vmatprep.subr.bf16.mxu1 %v2710_v20  ;;  %v289_v22 = vld [vmem:[%s3297_s4] sm:$0x1]  ;;  %v290_v25 = vld [vmem:[%s3297_s4 + $0x1] sm:$0x1] }
  0x50   :  { %2503 = vmatpush3.bf16.msra.mxu0 %v2500_v16  ;;  %v291_v23 = vcvt.s32.f32 %v289_v22 }
  0x51   :  { %2505 = vmatprep.subr.bf16.mxu0 %v2504_v21 }
  0x54   :  { %2507 = vmatpush3.bf16.msra.mxu0 %v2504_v21 }
  0x55   :  { %2509 = vmatprep.subr.bf16.mxu0 %v2508_v24 }
  0x58   :  { %2511 = vmatpush3.bf16.msra.mxu0 %v2508_v24  ;;  %v2120_v24 = vadd.f32 -1.0, %v291_v23 }
  0x59   :  { %2513 = vmatprep.subr.bf16.mxu0 %v2512_v27 }
  0x5c   :  { %2515 = vmatpush3.bf16.msra.mxu0 %v2512_v27  ;;  %v295_v27 = vmul.f32 1e+09, %v2120_v24 }
  0x5d   :  { %2518 = vmatprep.subr.msk.bf16.mxu0 %vm2517_vm2, %v2516_v28 }
  0x5e   :  { %v2940_v29 = vrot.slane %v295_v27, %v301_v26 }
  0x60   :  { %2521 = vmatpush3.bf16.msk.msra.mxu0 %vm2517_vm2, %v2516_v28  ;;  %v292_v28 = vcvt.s32.f32 %v290_v25  ;;  %vm1078_vm2 = vcmask 523264  }
  0x61   :  { %2336 = vmatprep.subr.bf16.mxu0 %v2710_v20 }
  0xc9   :  { %v120_v31 = vpop.permute.xlu1 %119  ;;  %v117_v32 = vpop.permute.xlu0 %116 }
  0xca   :  { %vm122_vm4 = vcmp.eq.s32.totalorder %v112_v34, %v120_v31  ;;  %vm121_vm8 = vcmp.eq.s32.totalorder %v112_v34, %v117_v32  ;;  %v2121_v31 = vadd.f32 -1.0, %v292_v28 }
  0xcd   :  { %v130_v35 = vpop.permute.xlu1 %129  ;;  %v127_v36 = vpop.permute.xlu0 %126 }
  0xce   :  { %vm132_vm5 = vcmp.eq.s32.totalorder %v112_v34, %v130_v35  ;;  %vm131_vm6 = vcmp.eq.s32.totalorder %v112_v34, %v127_v36 }
  0xcf   :  { %vm134_vm7 = vmor %vm122_vm4, %vm132_vm5 }
  0xd0   :  { %vm138_vm9 = vmor %vm134_vm7, %vm136_vm3 }
  0xd1   :  { %vm133_vm10 = vmor %vm121_vm8, %vm131_vm6  ;;  %v2114_v37 = vsel %vm138_vm9, 1.0, %v2710_v20 }
  0xd2   :  { %vm137_vm12 = vmor %vm133_vm10, %vm136_vm3 }
  0xd3   :  { %v2113_v38 = vsel %vm137_vm12, 1.0, %v2710_v20 }
  0xd4   :  { %2313 = vmatprep.mubr.msk.f32.mxu0 %vm157_vm11, %v2113_v38  ;;  %v296_v38 = vmul.f32 1e+09, %v2121_v31 }
  0xd5   :  { %2314 = vmatmul.mubr.msk.f32.vlgmr.msra.gmra.mrb[0].mxu0 %vm157_vm11, %v2114_v37 }
  0xd6   :  { %2338 = vmatprep.mubr.msk.bf16.mxu0 %vm2712_vm14, %v2710_v20 }
 0x1a8   :  { %v2315_v39 = vpop.f32.mrb[0].mxu0 }
 0x1a9   :  { %v234_v40 = vpop.f32.mrb[1].mxu0  ;;  %v249_v41 = vsel %vm245_vm13, %v2315_v39, 0.0 }
 0x1aa   :  { %250 = vadd.xlane.f32.xlu1 %v249_v41  ;;  %v246_v42 = vsel %vm245_vm13, %v234_v40, 0.0 }
 0x1ab   :  { %247 = vadd.xlane.f32.xlu0 %v246_v42 }
 0x237   :  { %v251_v43 = vpop.xlane.xlu1 %250 }
 0x238   :  { %v254_v44 = vmul.f32 0.03125, %v251_v43  ;;  %v248_v45 = vpop.xlane.xlu0 %247 }
 0x239   :  { %v253_v46 = vmul.f32 0.03125, %v248_v45 }
 0x23a   :  { %v256_v47 = vsub.f32 %v2315_v39, %v254_v44 }
 0x23b   :  { %v255_v48 = vsub.f32 %v234_v40, %v253_v46  ;;  %v2944_v40 = vrot.slane %v296_v38, %v301_v26 }
 0x23c   :  { %v258_v51 = vmul.f32 %v256_v47, %v256_v47 }
 0x23d   :  { %v257_v49 = vmul.f32 %v255_v48, %v255_v48 }
 0x23e   :  { %v262_v52 = vsel %vm245_vm13, %v258_v51, 0.0 }
 0x23f   :  { %v259_v50 = vsel %vm245_vm13, %v257_v49, 0.0 }
 0x240   :  { %260 = vadd.xlane.f32.xlu0 %v259_v50 }
 0x244   :  { %263 = vadd.xlane.f32.xlu0 %v262_v52 }
 0x2cd   :  { %v261_v55 = vpop.xlane.xlu0 %260 }
 0x2ce   :  { %v265_v56 = vmul.f32 0.03125, %v261_v55 }
 0x2d0   :  { %v267_v57 = vadd.f32 1e-12, %v265_v56 }
 0x2d1   :  { %v264_v58 = vpop.xlane.xlu0 %263 }
 0x2d2   :  { %2572 = vrsqrt.f32 %v267_v57  ;;  %v266_v59 = vmul.f32 0.03125, %v264_v58 }
 0x2d4   :  { %v268_v60 = vadd.f32 1e-12, %v266_v59 }
 0x2d6   :  { %2574 = vrsqrt.f32 %v268_v60 }
 0x2dc   :  { %v2573_v61 = vpop.eup %2572 }
 0x2dd   :  { %v271_v62 = vmul.f32 %v2573_v61, %v255_v48 }
 0x2df   :  { %v279_v2 = vmul.f32 %v2118_v63, %v271_v62 }
 0x2e0   :  { %v2575_v0 = vpop.eup %2574 }
 0x2e1   :  { %v272_v1 = vmul.f32 %v2575_v0, %v256_v47  ;;  %v2901_v5 = vadd.f32 %v2119_v3, %v279_v2 }
 0x2e3   :  { %v280_v4 = vmul.f32 %v2118_v63, %v272_v1 }
 0x2e5   :  { %v2903_v6 = vadd.f32 %v2119_v3, %v280_v4 }
 0x2e7   :  { %v309_v7 = vpack.c.bf16 %v2903_v6, %v2901_v5 }
 0x2e9   :  { %2321 = vmatmul.mubr.msk.bf16.vlgmr.msra.gmra.mrb[0].mxu1 %vm245_vm13, %v309_v7 }
 0x2ea   :  { %2326 = vmatprep.mubr.msk.bf16.mxu1 %vm2712_vm14, %v2710_v20 }
 0x3bc   :  { %v370_v9 = vpop.f32.mrb[0].mxu1 }
 0x3bd   :  { %v371_v10 = vadd.f32 %v2122_v8, %v370_v9  ;;  %v2322_v11 = vpop.f32.mrb[1].mxu1 }
 0x3be   :  { %v373_v12 = vpop.f32.mrb[2].mxu1 }
 0x3bf   :  { %v2913_v13 = vpack.c.bf16 %v371_v10, %v371_v10  ;;  %v374_v14 = vadd.f32 %v2122_v8, %v373_v12  ;;  %v2323_v15 = vpop.f32.mrb[3].mxu1 }
 0x3c1   :  { %v2915_v16 = vpack.c.bf16 %v374_v14, %v374_v14  ;;  %380 = vrot.lane.b32.xlu1 %v2913_v13, %s2713_s5 }
 0x3c3   :  { %430 = vrot.lane.b32.xlu0 %v2915_v16, %s2713_s5 }
 0x433   :  { %v381_v17 = vpop.permute.xlu1 %380 }
 0x434   :  { %v387_v18 = vsel %vm382_vm15, %v381_v17, 0 }
 0x435   :  { %2325 = vmatpush3.bf16.xpose.msra.mxu1 %v387_v18  ;;  %v431_v19 = vpop.permute.xlu0 %430 }
 0x436   :  { %2330 = vmatprep.subr.bf16.mxu1 %v2710_v20  ;;  %v436_v21 = vsel %vm382_vm15, %v431_v19, 0 }
 0x43c   :  { %2327 = vmatmul.mubr.msk.bf16.vlgmr.msra.gmra.mrb[4].mxu1 %vm382_vm15, %v2913_v13 }
 0x43d   :  { %2331 = vmatpush3.bf16.xpose.msra.mxu1 %v436_v21  ;;  %2332 = vmatprep.mubr.msk.bf16.mxu1 %vm2712_vm14, %v2710_v20 }
 0x43e   :  { %2342 = vmatprep.subr.bf16.mxu1 %v2710_v20 }
 0x444   :  { %2333 = vmatmul.mubr.msk.bf16.vlgmr.msra.gmra.mrb[8].mxu1 %vm382_vm15, %v2915_v16 }
 0x445   :  { %2344 = vmatprep.mubr.msk.bf16.mxu1 %vm2712_vm14, %v2710_v20 }
 0x50f   :  { %v423_v32 = vpop.f32.mrb[4].mxu1 }
 0x510   :  { %v478_v33 = vmul.f32 0.25, %v423_v32  ;;  %v2328_v34 = vpop.f32.mrb[5].mxu1 }
 0x511   :  { %v426_v35 = vpop.f32.mrb[6].mxu1 }
 0x512   :  { %v2329_v36 = vpop.f32.mrb[7].mxu1  ;;  %v480_v37 = vadd.f32 %v478_v33, %v2940_v29 }
 0x514   :  { %v483_v39 = vsel %vm482_vm0, %v480_v37, -inf }
 0x515   :  { %484 = vmax.xlane.f32.xlu1 %v483_v39 }
 0x517   :  { %v472_v30 = vpop.f32.mrb[8].mxu1 }
 0x518   :  { %v479_v41 = vmul.f32 0.25, %v472_v30  ;;  %v2334_v42 = vpop.f32.mrb[9].mxu1 }
 0x519   :  { %v475_v43 = vpop.f32.mrb[10].mxu1 }
 0x51a   :  { %v2335_v44 = vpop.f32.mrb[11].mxu1  ;;  %v481_v45 = vadd.f32 %v479_v41, %v2944_v40 }
 0x51c   :  { %v486_v46 = vsel %vm482_vm0, %v481_v45, -inf }
 0x51d   :  { %487 = vmax.xlane.f32.xlu0 %v486_v46 }
 0x526   :  { %507 = vrot.lane.b32.xlu1 %v2913_v13, %s3293_s1 }
 0x5a2   :  { %v485_v47 = vpop.xlane.xlu1 %484 }
 0x5a3   :  { %v489_v48 = vsub.f32 %v480_v37, %v485_v47 }
 0x5a5   :  { %v491_v49 = vmul.f32 1.442695, %v489_v48 }
 0x5a6   :  { %v508_v50 = vpop.permute.xlu1 %507 }
 0x5a7   :  { %2576 = vpow2.f32 %v491_v49  ;;  %v514_v51 = vsel %vm512_vm1, %v508_v50, 0 }
 0x5a8   :  { %2337 = vmatpush3.bf16.msra.mxu0 %v514_v51 }
 0x5a9   :  { %2348 = vmatprep.subr.bf16.mxu0 %v2710_v20 }
 0x5aa   :  { %v488_v52 = vpop.xlane.xlu0 %487 }
 0x5ab   :  { %v490_v53 = vsub.f32 %v481_v45, %v488_v52 }
 0x5ad   :  { %v493_v54 = vmul.f32 1.442695, %v490_v53 }
 0x5af   :  { %2578 = vpow2.f32 %v493_v54 }
 0x5b1   :  { %v2577_v55 = vpop.eup %2576 }
 0x5b2   :  { %v495_v56 = vsel %vm482_vm0, %v2577_v55, 0.0 }
 0x5b3   :  { %496 = vadd.xlane.f32.xlu1 %v495_v56 }
 0x5b9   :  { %v2579_v57 = vpop.eup %2578 }
 0x5ba   :  { %v498_v58 = vsel %vm482_vm0, %v2579_v57, 0.0 }
 0x5bb   :  { %499 = vadd.xlane.f32.xlu0 %v498_v58 }
 0x5c4   :  { %606 = vrot.lane.b32.xlu1 %v2913_v13, %s2714_s24 }
 0x5c8   :  { %656 = vrot.lane.b32.xlu1 %v2915_v16, %s2714_s24 }
 0x5cc   :  { %654 = vrot.lane.b32.xlu1 %v2915_v16, %s2715_s25 }
 0x5d1   :  { %556 = vrot.lane.b32.xlu0 %v2915_v16, %s3293_s1 }
 0x5d5   :  { %604 = vrot.lane.b32.xlu0 %v2913_v13, %s2715_s25 }
 0x640   :  { %v497_v59 = vpop.xlane.xlu1 %496 }
 0x641   :  { %2580 = vrcp.f32 %v497_v59 }
 0x644   :  { %v607_v0 = vpop.permute.xlu1 %606 }
 0x645   :  { %v612_v3 = vsel %vm382_vm15, %v607_v0, 0 }
 0x648   :  { %v500_v60 = vpop.xlane.xlu0 %499  ;;  %v657_v8 = vpop.permute.xlu1 %656 }
 0x649   :  { %2582 = vrcp.f32 %v500_v60  ;;  %v662_v11 = vsel %vm382_vm15, %v657_v8, 0  ;;  %v2552_v60 = vld [vmem:[#allocation6] sm:$0xff]  }
 0x64b   :  { %v2581_v61 = vpop.eup %2580 }
 0x64c   :  { %v503_v62 = vmul.f32 %v2581_v61, %v2577_v55  ;;  %v557_v63 = vpop.permute.xlu0 %556  ;;  %v655_v12 = vpop.permute.xlu1 %654  ;;  %v2553_v61 = vld [vmem:[#allocation6 + $0x8] sm:$0xff]  }
 0x64d   :  { %v562_v1 = vsel %vm512_vm1, %v557_v63, 0 }
 0x64e   :  { %2343 = vmatpush3.bf16.msra.mxu1 %v562_v1  ;;  %v505_v2 = vpack.c.bf16 %v503_v62, %v503_v62 }
 0x64f   :  { %2354 = vmatprep.subr.bf16.mxu1 %v2710_v20 }
 0x650   :  { %2339 = vmatmul.mubr.msk.bf16.vlgmr.msra.gmra.mrb[4].mxu0 %vm482_vm0, %v505_v2  ;;  %v605_v10 = vpop.permute.xlu0 %604 }
 0x651   :  { %2349 = vmatpush3.bf16.xpose.msra.mxu0 %v612_v3  ;;  %2350 = vmatprep.mubr.msk.bf16.mxu0 %vm2712_vm14, %v2710_v20 }
 0x652   :  { %2360 = vmatprep.subr.bf16.mxu0 %v2710_v20 }
 0x653   :  { %v2583_v4 = vpop.eup %2582 }
 0x654   :  { %v504_v7 = vmul.f32 %v2583_v4, %v2579_v57 }
 0x656   :  { %v506_v9 = vpack.c.bf16 %v504_v7, %v504_v7 }
 0x658   :  { %2345 = vmatmul.mubr.msk.bf16.vlgmr.msra.gmra.mrb[12].mxu1 %vm482_vm0, %v506_v9  ;;  %2351 = vmatmul.mubr.msk.bf16.vlgmr.msra.gmra.mrb[8].mxu0 %vm382_vm15, %v605_v10 }
 0x659   :  { %2355 = vmatpush3.bf16.xpose.msra.mxu1 %v662_v11  ;;  %2356 = vmatprep.mubr.msk.bf16.mxu1 %vm2712_vm14, %v2710_v20 }
 0x65a   :  { %2366 = vmatprep.subr.bf16.mxu1 %v2710_v20  ;;  %2362 = vmatprep.mubr.msk.bf16.mxu0 %vm2712_vm14, %v2710_v20 }
 0x660   :  { %2357 = vmatmul.mubr.msk.bf16.vlgmr.msra.gmra.mrb[16].mxu1 %vm382_vm15, %v655_v12 }
 0x661   :  { %2368 = vmatprep.mubr.msk.bf16.mxu1 %vm2712_vm14, %v2710_v20 }
 0x723   :  { %v2982_v14 = vpop.f32.mrb[4].mxu0 }
 0x724   :  { %v2340_v15 = vpop.f32.mrb[5].mxu0 }
 0x725   :  { %v553_v17 = vpop.f32.mrb[6].mxu0 }
 0x726   :  { %v2341_v18 = vpop.f32.mrb[7].mxu0 }
 0x727   :  { %v2134_v18 = vld [vmem:[%s3267_s9] ss:$0 sm:$0xff] }
 0x72b   :  { %v2984_v19 = vpop.f32.mrb[12].mxu1  ;;  %v648_v21 = vpop.f32.mrb[8].mxu0 }
 0x72c   :  { %v704_v22 = vmul.f32 0.25, %v648_v21  ;;  %v2346_v23 = vpop.f32.mrb[13].mxu1  ;;  %v2352_v24 = vpop.f32.mrb[9].mxu0 }
 0x72d   :  { %v601_v25 = vpop.f32.mrb[14].mxu1  ;;  %v651_v26 = vpop.f32.mrb[10].mxu0 }
 0x72e   :  { %v2347_v27 = vpop.f32.mrb[15].mxu1  ;;  %v2353_v28 = vpop.f32.mrb[11].mxu0  ;;  %v706_v31 = vadd.f32 %v704_v22, %v2940_v29 }
 0x730   :  { %v708_v32 = vsel %vm482_vm0, %v706_v31, -inf }
 0x731   :  { %709 = vmax.xlane.f32.xlu0 %v708_v32 }
 0x733   :  { %v698_v33 = vpop.f32.mrb[16].mxu1 }
 0x734   :  { %v705_v34 = vmul.f32 0.25, %v698_v33  ;;  %v2358_v35 = vpop.f32.mrb[17].mxu1 }
 0x735   :  { %v701_v36 = vpop.f32.mrb[18].mxu1 }
 0x736   :  { %v2359_v37 = vpop.f32.mrb[19].mxu1  ;;  %v707_v38 = vadd.f32 %v705_v34, %v2944_v40 }
 0x738   :  { %v711_v39 = vsel %vm482_vm0, %v707_v38, -inf }
 0x739   :  { %712 = vmax.xlane.f32.xlu1 %v711_v39 }
 0x74a   :  { %732 = vrot.lane.b32.xlu1 %v2913_v13, %s2716_s3 }
 0x7be   :  { %v710_v30 = vpop.xlane.xlu0 %709 }
 0x7bf   :  { %v714_v41 = vsub.f32 %v706_v31, %v710_v30  ;;  %v2555_v30 = vld [vmem:[%s3270_s12 + $0x8] sm:$0xff]  }
 0x7c1   :  { %v716_v42 = vmul.f32 1.442695, %v714_v41 }
 0x7c3   :  { %2584 = vpow2.f32 %v716_v42 }
 0x7c6   :  { %v713_v43 = vpop.xlane.xlu1 %712 }
 0x7c7   :  { %v715_v44 = vsub.f32 %v707_v38, %v713_v43 }
 0x7c9   :  { %v718_v45 = vmul.f32 1.442695, %v715_v44 }
 0x7ca   :  { %v733_v46 = vpop.permute.xlu1 %732 }
 0x7cb   :  { %2586 = vpow2.f32 %v718_v45  ;;  %v738_v47 = vsel %vm512_vm1, %v733_v46, 0 }
 0x7cc   :  { %2361 = vmatpush3.bf16.msra.mxu0 %v738_v47 }
 0x7cd   :  { %v2585_v48 = vpop.eup %2584  ;;  %2372 = vmatprep.subr.bf16.mxu0 %v2710_v20 }
 0x7ce   :  { %v720_v49 = vsel %vm482_vm0, %v2585_v48, 0.0 }
 0x7cf   :  { %721 = vadd.xlane.f32.xlu0 %v720_v49 }
 0x7d5   :  { %v2587_v50 = vpop.eup %2586 }
 0x7d6   :  { %v723_v13 = vsel %vm482_vm0, %v2587_v50, 0.0 }
 0x7d7   :  { %724 = vadd.xlane.f32.xlu0 %v723_v13 }
 0x7ed   :  { %780 = vrot.lane.b32.xlu0 %v2915_v16, %s2716_s3 }
 0x85c   :  { %v722_v51 = vpop.xlane.xlu0 %721 }
 0x85d   :  { %2588 = vrcp.f32 %v722_v51 }
 0x864   :  { %v725_v52 = vpop.xlane.xlu0 %724 }
 0x865   :  { %2590 = vrcp.f32 %v725_v52  ;;  %v2139_v52 = vld [vmem:[%s3269_s11] ss:$0 sm:$0xff] }
 0x867   :  { %v2589_v53 = vpop.eup %2588 }
 0x868   :  { %v728_v54 = vmul.f32 %v2589_v53, %v2585_v48  ;;  %v781_v55 = vpop.permute.xlu0 %780  ;;  %v2138_v48 = vld [vmem:[%s3268_s10] ss:$0 sm:$0xff] }
 0x869   :  { %v786_v56 = vsel %vm512_vm1, %v781_v55, 0 }
 0x86a   :  { %2367 = vmatpush3.bf16.msra.mxu1 %v786_v56  ;;  %v730_v57 = vpack.c.bf16 %v728_v54, %v728_v54 }
 0x86b   :  { %2380 = vmatprep.subr.bf16.mxu1 %v2710_v20 }
 0x86c   :  { %2363 = vmatmul.mubr.msk.bf16.vlgmr.msra.gmra.mrb[12].mxu0 %vm482_vm0, %v730_v57  ;;  %v2556_v57 = vld [vmem:[%s3272_s14] sm:$0xff]  }
 0x86d   :  { %2376 = vmatprep.mubr.msk.bf16.mxu0 %vm2712_vm14, %v2710_v20  ;;  %2373 = vmatpush3.bf16.msra.mxu0 %v2552_v60  ;;  %v2140_v60 = vld [vmem:[%s3271_s13] ss:$0 sm:$0xff] }
 0x86e   :  { %2374 = vmatprep.subr.bf16.mxu0 %v2710_v20 }
 0x86f   :  { %v2591_v58 = vpop.eup %2590 }
 0x870   :  { %v729_v16 = vmul.f32 %v2591_v58, %v2587_v50  ;;  %v2557_v58 = vld [vmem:[%s3272_s14 + $0x8] sm:$0xff]  }
 0x871   :  { %2375 = vmatpush3.bf16.msra.mxu0 %v2553_v61 }
 0x872   :  { %v731_v59 = vpack.c.bf16 %v729_v16, %v729_v16  ;;  %2388 = vmatprep.subr.bf16.mxu0 %v2710_v20  ;;  %v2558_v16 = vld [vmem:[%s3272_s14 + $0x10] sm:$0xff]  }
 0x874   :  { %2369 = vmatmul.mubr.msk.bf16.vlgmr.msra.gmra.mrb[20].mxu1 %vm482_vm0, %v731_v59  ;;  %v2559_v59 = vld [vmem:[%s3272_s14 + $0x18] sm:$0xff]  }
 0x875   :  { %2384 = vmatprep.mubr.msk.bf16.mxu1 %vm2712_vm14, %v2710_v20 }
 0x93f   :  { %v774_v62 = vpop.f32.mrb[12].mxu0 }
 0x940   :  { %v2364_v63 = vpop.f32.mrb[13].mxu0 }
 0x941   :  { %v777_v0 = vpop.f32.mrb[14].mxu0 }
 0x942   :  { %v2365_v1 = vpop.f32.mrb[15].mxu0 }
 0x947   :  { %v822_v2 = vpop.f32.mrb[20].mxu1 }
 0x948   :  { %v2540_v3 = vpack.i.bf16 %v822_v2, %v774_v62  ;;  %v2370_v4 = vpop.f32.mrb[21].mxu1 }
 0x949   :  { %v825_v7 = vpop.f32.mrb[22].mxu1 }
 0x94a   :  { %2541 = vrot.lane.b32.xlu1 %v2540_v3, %s2717_s8  ;;  %v2371_v8 = vpop.f32.mrb[23].mxu1 }
 0x9bc   :  { %v2542_v9 = vpop.permute.xlu1 %2541 }
 0x9bd   :  { %v2544_v10 = vunpack.i.h.bf16 %v2542_v9  ;;  %v2543_v11 = vunpack.i.l.bf16 %v2542_v9 }
 0x9bf   :  { %v837_v12 = vsel %vm382_vm15, %v2984_v19, %v2544_v10  ;;  %v836_v15 = vsel %vm382_vm15, %v2982_v14, %v2543_v11 }
 0x9c0   :  { %v838_v17 = vpack.c.bf16 %v837_v12, %v836_v15 }
 0x9c2   :  { %2377 = vmatmul.mubr.msk.bf16.vlgmr.msra.gmra.mrb[16].mxu0 %vm245_vm13, %v838_v17 }
 0x9c3   :  { %2396 = vmatprep.mubr.msk.bf16.mxu0 %vm2712_vm14, %v2710_v20  ;;  %2389 = vmatpush3.bf16.msra.mxu0 %v2556_v57 }
 0x9c4   :  { %2390 = vmatprep.subr.bf16.mxu0 %v2710_v20 }
 0x9c7   :  { %2391 = vmatpush3.bf16.msra.mxu0 %v2557_v58 }
 0x9c8   :  { %2392 = vmatprep.subr.bf16.mxu0 %v2710_v20 }
 0x9cb   :  { %2393 = vmatpush3.bf16.msra.mxu0 %v2558_v16 }
 0x9cc   :  { %2394 = vmatprep.subr.bf16.mxu0 %v2710_v20 }
 0x9cf   :  { %2395 = vmatpush3.bf16.msra.mxu0 %v2559_v59 }
 0x9d0   :  { %2414 = vmatprep.subr.bf16.mxu0 %v2710_v20 }
 0xa95   :  { %v899_v21 = vpop.f32.mrb[16].mxu0 }
 0xa96   :  { %v900_v22 = vadd.f32 %v2134_v18, %v899_v21  ;;  %v2378_v23 = vpop.f32.mrb[17].mxu0 }
 0xa97   :  { %v902_v24 = vpop.f32.mrb[18].mxu0 }
 0xa98   :  { %v903_v25 = vadd.f32 %v2134_v18, %v902_v24  ;;  %v2379_v26 = vpop.f32.mrb[19].mxu0  ;;  %v906_v19 = vadd.f32 %v900_v22, %v2901_v5 }
 0xa9a   :  { %v910_v14 = vsel %vm245_vm13, %v906_v19, 0.0  ;;  %v907_v27 = vadd.f32 %v903_v25, %v2903_v6  ;;  %v2554_v6 = vld [vmem:[%s3270_s12] sm:$0xff]  }
 0xa9b   :  { %911 = vadd.xlane.f32.xlu1 %v910_v14  ;;  %2381 = vmatpush3.bf16.msra.mxu1 %v2554_v6 }
 0xa9c   :  { %v913_v28 = vsel %vm245_vm13, %v907_v27, 0.0  ;;  %2382 = vmatprep.subr.bf16.mxu1 %v2710_v20 }
 0xa9d   :  { %914 = vadd.xlane.f32.xlu0 %v913_v28 }
 0xa9f   :  { %2383 = vmatpush3.bf16.msra.mxu1 %v2555_v30 }
 0xaa0   :  { %2400 = vmatprep.subr.bf16.mxu1 %v2710_v20 }
 0xb28   :  { %v912_v31 = vpop.xlane.xlu1 %911 }
 0xb29   :  { %v916_v32 = vmul.f32 0.03125, %v912_v31 }
 0xb2a   :  { %v915_v33 = vpop.xlane.xlu0 %914 }
 0xb2b   :  { %v918_v34 = vsub.f32 %v906_v19, %v916_v32  ;;  %v917_v35 = vmul.f32 0.03125, %v915_v33 }
 0xb2d   :  { %v919_v36 = vsub.f32 %v907_v27, %v917_v35  ;;  %v920_v37 = vmul.f32 %v918_v34, %v918_v34  ;;  %v2144_v27 = vld [vmem:[%s3273_s15] ss:$0 sm:$0xff] }
 0xb2f   :  { %v922_v38 = vsel %vm245_vm13, %v920_v37, 0.0  ;;  %v921_v39 = vmul.f32 %v919_v36, %v919_v36 }
 0xb30   :  { %923 = vadd.xlane.f32.xlu0 %v922_v38 }
 0xb31   :  { %v925_v5 = vsel %vm245_vm13, %v921_v39, 0.0 }
 0xb32   :  { %926 = vadd.xlane.f32.xlu1 %v925_v5 }
 0xbbd   :  { %v924_v41 = vpop.xlane.xlu0 %923 }
 0xbbe   :  { %v928_v42 = vmul.f32 0.03125, %v924_v41 }
 0xbbf   :  { %v927_v43 = vpop.xlane.xlu1 %926 }
 0xbc0   :  { %v930_v44 = vadd.f32 1e-12, %v928_v42  ;;  %v929_v45 = vmul.f32 0.03125, %v927_v43 }
 0xbc2   :  { %2592 = vrsqrt.f32 %v930_v44  ;;  %v931_v46 = vadd.f32 1e-12, %v929_v45 }
 0xbc4   :  { %2594 = vrsqrt.f32 %v931_v46 }
 0xbcc   :  { %v2593_v47 = vpop.eup %2592 }
 0xbcd   :  { %v934_v49 = vmul.f32 %v2593_v47, %v918_v34 }
 0xbce   :  { %v2595_v50 = vpop.eup %2594 }
 0xbcf   :  { %v942_v13 = vmul.f32 %v2138_v48, %v934_v49  ;;  %v935_v51 = vmul.f32 %v2595_v50, %v919_v36  ;;  %v2561_v49 = vld [vmem:[#allocation4 + $0x18] sm:$0xff]  }
 0xbd1   :  { %v943_v53 = vmul.f32 %v2138_v48, %v935_v51  ;;  %v950_v54 = vadd.f32 %v2139_v52, %v942_v13  ;;  %v2560_v48 = vld [vmem:[#allocation4 + $0x10] sm:$0xff]  }
 0xbd3   :  { %v951_v55 = vadd.f32 %v2139_v52, %v943_v53 }
 0xbd5   :  { %v952_v56 = vpack.c.bf16 %v951_v55, %v950_v54 }
 0xbd7   :  { %2385 = vmatmul.mubr.msk.bf16.vlgmr.msra.gmra.mrb[24].mxu1 %vm245_vm13, %v952_v56  ;;  %v2150_v56 = vld [vmem:[%s3274_s16] ss:$0 sm:$0xff] }
 0xbd8   :  { %2404 = vmatprep.mubr.msk.bf16.mxu1 %vm2712_vm14, %v2710_v20  ;;  %2401 = vmatpush3.bf16.msra.mxu1 %v2560_v48 }
 0xbd9   :  { %2402 = vmatprep.subr.bf16.mxu1 %v2710_v20 }
 0xbdc   :  { %2403 = vmatpush3.bf16.msra.mxu1 %v2561_v49 }
 0xbdd   :  { %2408 = vmatprep.subr.bf16.mxu1 %v2710_v20 }
 0xcaa   :  { %v1013_v61 = vpop.f32.mrb[24].mxu1 }
 0xcab   :  { %v1014_v62 = vadd.f32 %v2140_v60, %v1013_v61  ;;  %v2386_v63 = vpop.f32.mrb[25].mxu1 }
 0xcac   :  { %v1016_v0 = vpop.f32.mrb[26].mxu1 }
 0xcad   :  { %v1020_v1 = vmul.f32 %v1014_v62, %v1014_v62  ;;  %v1017_v2 = vadd.f32 %v2140_v60, %v1016_v0  ;;  %v2387_v3 = vpop.f32.mrb[27].mxu1  ;;  %v2151_v60 = vld [vmem:[%s3275_s17] ss:$0 sm:$0xff] }
 0xcaf   :  { %v1022_v4 = vmul.f32 %v1020_v1, %v1014_v62  ;;  %v1021_v7 = vmul.f32 %v1017_v2, %v1017_v2  ;;  %v2153_v1 = vld [vmem:[%s3265_s7 + $0x1] ss:$0 sm:$0xff] }
 0xcb1   :  { %v1024_v8 = vmul.f32 0.044715, %v1022_v4  ;;  %v1023_v9 = vmul.f32 %v1021_v7, %v1017_v2 }
 0xcb3   :  { %v1026_v10 = vadd.f32 %v1024_v8, %v1014_v62  ;;  %v1025_v11 = vmul.f32 0.044715, %v1023_v9 }
 0xcb5   :  { %v1028_v12 = vmul.f32 0.7978846, %v1026_v10  ;;  %v1027_v15 = vadd.f32 %v1025_v11, %v1017_v2 }
 0xcb7   :  { %2596 = vtanh.f32 %v1028_v12  ;;  %v1029_v17 = vmul.f32 0.7978846, %v1027_v15 }
 0xcb9   :  { %2598 = vtanh.f32 %v1029_v17 }
 0xcc1   :  { %v2597_v18 = vpop.eup %2596 }
 0xcc2   :  { %v1032_v21 = vadd.f32 1.0, %v2597_v18 }
 0xcc3   :  { %v2599_v22 = vpop.eup %2598 }
 0xcc4   :  { %v1034_v23 = vmul.f32 0.5, %v1032_v21  ;;  %v1033_v24 = vadd.f32 1.0, %v2599_v22 }
 0xcc6   :  { %v1035_v25 = vmul.f32 0.5, %v1033_v24  ;;  %v1036_v26 = vmul.f32 %v1034_v23, %v1014_v62 }
 0xcc8   :  { %v1037_v19 = vmul.f32 %v1035_v25, %v1017_v2 }
 0xcca   :  { %v1038_v14 = vpack.c.bf16 %v1037_v19, %v1036_v26 }
 0xccc   :  { %2397 = vmatmul.mubr.msk.bf16.vlgmr.msra.gmra.mrb[20].mxu0 %vm1078_vm2, %v1038_v14 }
 0xccd   :  { %2416 = vmatprep.mubr.msk.bf16.mxu0 %vm2712_vm14, %v2710_v20 }
 0xd9f   :  { %v1116_v28 = vpop.f32.mrb[20].mxu0 }
 0xda0   :  { %v1117_v31 = vadd.f32 %v2144_v27, %v1116_v28  ;;  %v2398_v32 = vpop.f32.mrb[21].mxu0 }
 0xda1   :  { %v1119_v33 = vpop.f32.mrb[22].mxu0 }
 0xda2   :  { %v1120_v34 = vadd.f32 %v2144_v27, %v1119_v33  ;;  %v2399_v35 = vpop.f32.mrb[23].mxu0  ;;  %v1123_v36 = vadd.f32 %v1117_v31, %v950_v54 }
 0xda4   :  { %v1127_v37 = vsel %vm245_vm13, %v1123_v36, 0.0  ;;  %v1124_v38 = vadd.f32 %v1120_v34, %v951_v55 }
 0xda5   :  { %1128 = vadd.xlane.f32.xlu0 %v1127_v37 }
 0xda6   :  { %v1130_v39 = vsel %vm245_vm13, %v1124_v38, 0.0 }
 0xda7   :  { %1131 = vadd.xlane.f32.xlu1 %v1130_v39 }
 0xe32   :  { %v1129_v5 = vpop.xlane.xlu0 %1128 }
 0xe33   :  { %v1133_v6 = vmul.f32 0.03125, %v1129_v5 }
 0xe34   :  { %v1132_v30 = vpop.xlane.xlu1 %1131 }
 0xe35   :  { %v1135_v41 = vsub.f32 %v1123_v36, %v1133_v6  ;;  %v1134_v42 = vmul.f32 0.03125, %v1132_v30 }
 0xe37   :  { %v1136_v43 = vsub.f32 %v1124_v38, %v1134_v42  ;;  %v1137_v44 = vmul.f32 %v1135_v41, %v1135_v41 }
 0xe39   :  { %v1139_v45 = vsel %vm245_vm13, %v1137_v44, 0.0  ;;  %v1138_v46 = vmul.f32 %v1136_v43, %v1136_v43 }
 0xe3a   :  { %1140 = vadd.xlane.f32.xlu0 %v1139_v45 }
 0xe3b   :  { %v1142_v47 = vsel %vm245_vm13, %v1138_v46, 0.0 }
 0xe3c   :  { %1143 = vadd.xlane.f32.xlu1 %v1142_v47 }
 0xec7   :  { %v1141_v50 = vpop.xlane.xlu0 %1140 }
 0xec8   :  { %v1145_v13 = vmul.f32 0.03125, %v1141_v50 }
 0xec9   :  { %v1144_v51 = vpop.xlane.xlu1 %1143 }
 0xeca   :  { %v1147_v52 = vadd.f32 1e-12, %v1145_v13  ;;  %v1146_v53 = vmul.f32 0.03125, %v1144_v51 }
 0xecc   :  { %2600 = vrsqrt.f32 %v1147_v52  ;;  %v1148_v54 = vadd.f32 1e-12, %v1146_v53 }
 0xece   :  { %2602 = vrsqrt.f32 %v1148_v54 }
 0xed6   :  { %v2601_v55 = vpop.eup %2600 }
 0xed7   :  { %v1151_v57 = vmul.f32 %v2601_v55, %v1135_v41 }
 0xed8   :  { %v2603_v58 = vpop.eup %2602 }
 0xed9   :  { %v1159_v16 = vmul.f32 %v2150_v56, %v1151_v57  ;;  %v1152_v59 = vmul.f32 %v2603_v58, %v1136_v43 }
 0xedb   :  { %v1160_v61 = vmul.f32 %v2150_v56, %v1152_v59  ;;  %v3079_v62 = vadd.f32 %v2151_v60, %v1159_v16 }
 0xedd   :  { %v3081_v63 = vadd.f32 %v2151_v60, %v1160_v61 }
 0xedf   :  { %v1169_v0 = vpack.c.bf16 %v3081_v63, %v3079_v62 }
 0xee1   :  { %2405 = vmatmul.mubr.msk.bf16.vlgmr.msra.gmra.mrb[28].mxu1 %vm245_vm13, %v1169_v0 }
 0xee2   :  { %2410 = vmatprep.mubr.msk.bf16.mxu1 %vm2712_vm14, %v2710_v20 }
 0xfb4   :  { %v1232_v2 = vpop.f32.mrb[28].mxu1 }
 0xfb5   :  { %v1233_v3 = vadd.f32 %v2153_v1, %v1232_v2  ;;  %v2406_v4 = vpop.f32.mrb[29].mxu1 }
 0xfb6   :  { %v1235_v7 = vpop.f32.mrb[30].mxu1 }
 0xfb7   :  { %v3091_v8 = vpack.c.bf16 %v1233_v3, %v1233_v3  ;;  %v1236_v9 = vadd.f32 %v2153_v1, %v1235_v7  ;;  %v2407_v10 = vpop.f32.mrb[31].mxu1 }
 0xfb9   :  { %v3093_v11 = vpack.c.bf16 %v1236_v9, %v1236_v9  ;;  %1242 = vrot.lane.b32.xlu0 %v3091_v8, %s2713_s5 }
 0xfbb   :  { %1291 = vrot.lane.b32.xlu1 %v3093_v11, %s2713_s5 }
0x102b   :  { %v1243_v12 = vpop.permute.xlu0 %1242 }
0x102c   :  { %v1248_v15 = vsel %vm382_vm15, %v1243_v12, 0 }
0x102d   :  { %2409 = vmatpush3.bf16.xpose.msra.mxu1 %v1248_v15  ;;  %v1292_v17 = vpop.permute.xlu1 %1291 }
0x102e   :  { %v1297_v18 = vsel %vm382_vm15, %v1292_v17, 0  ;;  %2420 = vmatprep.subr.bf16.mxu1 %v2710_v20 }
0x102f   :  { %2415 = vmatpush3.bf16.xpose.msra.mxu0 %v1297_v18 }
0x1030   :  { %2426 = vmatprep.subr.bf16.mxu0 %v2710_v20 }
0x1034   :  { %2411 = vmatmul.mubr.msk.bf16.vlgmr.msra.gmra.mrb[32].mxu1 %vm382_vm15, %v3091_v8 }
0x1035   :  { %2422 = vmatprep.mubr.msk.bf16.mxu1 %vm2712_vm14, %v2710_v20 }
0x1036   :  { %2417 = vmatmul.mubr.msk.bf16.vlgmr.msra.gmra.mrb[24].mxu0 %vm382_vm15, %v3093_v11 }
0x1037   :  { %2428 = vmatprep.mubr.msk.bf16.mxu0 %vm2712_vm14, %v2710_v20 }
0x1107   :  { %v1284_v21 = vpop.f32.mrb[32].mxu1 }
0x1108   :  { %v1339_v22 = vmul.f32 0.25, %v1284_v21  ;;  %v2412_v23 = vpop.f32.mrb[33].mxu1 }
0x1109   :  { %v1287_v24 = vpop.f32.mrb[34].mxu1  ;;  %v1333_v25 = vpop.f32.mrb[24].mxu0 }
0x110a   :  { %v1340_v26 = vmul.f32 0.25, %v1333_v25  ;;  %v2413_v19 = vpop.f32.mrb[35].mxu1  ;;  %v2418_v14 = vpop.f32.mrb[25].mxu0  ;;  %v1341_v27 = vadd.f32 %v1339_v22, %v2940_v29 }
0x110b   :  { %v1336_v28 = vpop.f32.mrb[26].mxu0 }
0x110c   :  { %v2419_v31 = vpop.f32.mrb[27].mxu0  ;;  %v1343_v32 = vsel %vm482_vm0, %v1341_v27, -inf  ;;  %v1342_v33 = vadd.f32 %v1340_v26, %v2944_v40 }
0x110d   :  { %1344 = vmax.xlane.f32.xlu1 %v1343_v32 }
0x110e   :  { %v1346_v34 = vsel %vm482_vm0, %v1342_v33, -inf }
0x110f   :  { %1347 = vmax.xlane.f32.xlu0 %v1346_v34 }
0x111e   :  { %1415 = vrot.lane.b32.xlu1 %v3093_v11, %s3293_s1 }
0x1125   :  { %1367 = vrot.lane.b32.xlu0 %v3091_v8, %s3293_s1 }
0x119a   :  { %v1345_v35 = vpop.xlane.xlu1 %1344 }
0x119b   :  { %v1349_v36 = vsub.f32 %v1341_v27, %v1345_v35 }
0x119c   :  { %v1348_v37 = vpop.xlane.xlu0 %1347 }
0x119d   :  { %v1351_v38 = vmul.f32 1.442695, %v1349_v36  ;;  %v1350_v39 = vsub.f32 %v1342_v33, %v1348_v37 }
0x119e   :  { %v1416_v5 = vpop.permute.xlu1 %1415 }
0x119f   :  { %2604 = vpow2.f32 %v1351_v38  ;;  %v1353_v6 = vmul.f32 1.442695, %v1350_v39  ;;  %v1421_v30 = vsel %vm512_vm1, %v1416_v5, 0 }
0x11a0   :  { %v1368_v41 = vpop.permute.xlu0 %1367  ;;  %2427 = vmatpush3.bf16.msra.mxu0 %v1421_v30 }
0x11a1   :  { %2606 = vpow2.f32 %v1353_v6  ;;  %v1373_v42 = vsel %vm512_vm1, %v1368_v41, 0  ;;  %2438 = vmatprep.subr.bf16.mxu0 %v2710_v20 }
0x11a2   :  { %2421 = vmatpush3.bf16.msra.mxu1 %v1373_v42 }
0x11a3   :  { %2432 = vmatprep.subr.bf16.mxu1 %v2710_v20 }
0x11a9   :  { %v2605_v43 = vpop.eup %2604 }
0x11aa   :  { %v1355_v44 = vsel %vm482_vm0, %v2605_v43, 0.0 }
0x11ab   :  { %v2607_v45 = vpop.eup %2606  ;;  %1356 = vadd.xlane.f32.xlu0 %v1355_v44  ;;  %v2562_v44 = vld [vmem:[#allocation6 + $0x10] sm:$0xff]  }
0x11ac   :  { %v1358_v46 = vsel %vm482_vm0, %v2607_v45, 0.0 }
0x11ad   :  { %1359 = vadd.xlane.f32.xlu1 %v1358_v46 }
0x11be   :  { %1465 = vrot.lane.b32.xlu1 %v3091_v8, %s2714_s24 }
0x11c1   :  { %1515 = vrot.lane.b32.xlu0 %v3093_v11, %s2714_s24 }
0x11c2   :  { %1463 = vrot.lane.b32.xlu1 %v3091_v8, %s2715_s25 }
0x11c5   :  { %1513 = vrot.lane.b32.xlu0 %v3093_v11, %s2715_s25  ;;  %s3298_s25 = sld [smem:[#allocation14_spill]] }
0x1238   :  { %v1357_v47 = vpop.xlane.xlu0 %1356 }
0x1239   :  { %2608 = vrcp.f32 %v1357_v47 }
0x123a   :  { %v1360_v48 = vpop.xlane.xlu1 %1359 }
0x123b   :  { %2610 = vrcp.f32 %v1360_v48 }
0x123c   :  { %v1516_v54 = vpop.permute.xlu0 %1515 }
0x123d   :  { %v1521_v57 = vsel %vm382_vm15, %v1516_v54, 0 }
0x123e   :  { %v1466_v51 = vpop.permute.xlu1 %1465 }
0x123f   :  { %v1471_v55 = vsel %vm382_vm15, %v1466_v51, 0 }
0x1240   :  { %v1514_v16 = vpop.permute.xlu0 %1513 }
0x1242   :  { %v1464_v58 = vpop.permute.xlu1 %1463 }
0x1243   :  { %v2609_v49 = vpop.eup %2608 }
0x1244   :  { %v1363_v50 = vmul.f32 %v2609_v49, %v2605_v43 }
0x1245   :  { %v2611_v13 = vpop.eup %2610 }
0x1246   :  { %v1364_v52 = vmul.f32 %v2611_v13, %v2607_v45  ;;  %v1365_v53 = vpack.c.bf16 %v1363_v50, %v1363_v50  ;;  %v2563_v45 = vld [vmem:[#allocation6 + $0x18] sm:$0xff]  }
0x1248   :  { %2423 = vmatmul.mubr.msk.bf16.vlgmr.msra.gmra.mrb[36].mxu1 %vm482_vm0, %v1365_v53  ;;  %v1366_v56 = vpack.c.bf16 %v1364_v52, %v1364_v52 }
0x1249   :  { %2433 = vmatpush3.bf16.xpose.msra.mxu1 %v1471_v55  ;;  %2434 = vmatprep.mubr.msk.bf16.mxu1 %vm2712_vm14, %v2710_v20 }
0x124a   :  { %2429 = vmatmul.mubr.msk.bf16.vlgmr.msra.gmra.mrb[28].mxu0 %vm482_vm0, %v1366_v56  ;;  %2444 = vmatprep.subr.bf16.mxu1 %v2710_v20 }
0x124b   :  { %2439 = vmatpush3.bf16.xpose.msra.mxu0 %v1521_v57  ;;  %2440 = vmatprep.mubr.msk.bf16.mxu0 %vm2712_vm14, %v2710_v20 }
0x124c   :  { %2450 = vmatprep.subr.bf16.mxu0 %v2710_v20 }
0x1250   :  { %2435 = vmatmul.mubr.msk.bf16.vlgmr.msra.gmra.mrb[40].mxu1 %vm382_vm15, %v1464_v58 }
0x1251   :  { %2446 = vmatprep.mubr.msk.bf16.mxu1 %vm2712_vm14, %v2710_v20 }
0x1252   :  { %2441 = vmatmul.mubr.msk.bf16.vlgmr.msra.gmra.mrb[32].mxu0 %vm382_vm15, %v1514_v16 }
0x1253   :  { %2452 = vmatprep.mubr.msk.bf16.mxu0 %vm2712_vm14, %v2710_v20 }
0x131b   :  { %v3149_v59 = vpop.f32.mrb[36].mxu1 }
0x131c   :  { %v2424_v60 = vpop.f32.mrb[37].mxu1 }
0x131d   :  { %v1412_v61 = vpop.f32.mrb[38].mxu1  ;;  %v3151_v0 = vpop.f32.mrb[28].mxu0  ;;  %v2166_v60 = vld [vmem:[%s3267_s9 + $0x1] ss:$0 sm:$0xff] }
0x131e   :  { %v2425_v1 = vpop.f32.mrb[39].mxu1  ;;  %v2430_v2 = vpop.f32.mrb[29].mxu0 }
0x131f   :  { %v1460_v3 = vpop.f32.mrb[30].mxu0 }
0x1320   :  { %v2431_v4 = vpop.f32.mrb[31].mxu0 }
0x1323   :  { %v1507_v7 = vpop.f32.mrb[40].mxu1 }
0x1324   :  { %v1563_v9 = vmul.f32 0.25, %v1507_v7  ;;  %v2436_v10 = vpop.f32.mrb[41].mxu1 }
0x1325   :  { %v1510_v12 = vpop.f32.mrb[42].mxu1  ;;  %v1557_v15 = vpop.f32.mrb[32].mxu0 }
0x1326   :  { %v1564_v17 = vmul.f32 0.25, %v1557_v15  ;;  %v2437_v18 = vpop.f32.mrb[43].mxu1  ;;  %v2442_v21 = vpop.f32.mrb[33].mxu0  ;;  %v1565_v22 = vadd.f32 %v1563_v9, %v2940_v29 }
0x1327   :  { %v1560_v23 = vpop.f32.mrb[34].mxu0 }
0x1328   :  { %v2443_v24 = vpop.f32.mrb[35].mxu0  ;;  %v1567_v25 = vsel %vm482_vm0, %v1565_v22, -inf  ;;  %v1566_v26 = vadd.f32 %v1564_v17, %v2944_v40 }
0x1329   :  { %1568 = vmax.xlane.f32.xlu1 %v1567_v25 }
0x132a   :  { %v1570_v19 = vsel %vm482_vm0, %v1566_v26, -inf }
0x132b   :  { %1571 = vmax.xlane.f32.xlu0 %v1570_v19 }
0x13b6   :  { %v1569_v14 = vpop.xlane.xlu1 %1568 }
0x13b7   :  { %v1573_v27 = vsub.f32 %v1565_v22, %v1569_v14 }
0x13b8   :  { %v1572_v28 = vpop.xlane.xlu0 %1571 }
0x13b9   :  { %v1575_v31 = vmul.f32 1.442695, %v1573_v27  ;;  %v1574_v32 = vsub.f32 %v1566_v26, %v1572_v28  ;;  %v2565_v26 = vld [vmem:[%s3270_s12 + $0x18] sm:$0xff]  }
0x13bb   :  { %2612 = vpow2.f32 %v1575_v31  ;;  %v1577_v33 = vmul.f32 1.442695, %v1574_v32 }
0x13bd   :  { %2614 = vpow2.f32 %v1577_v33 }
0x13c5   :  { %v2613_v34 = vpop.eup %2612 }
0x13c6   :  { %v1579_v29 = vsel %vm482_vm0, %v2613_v34, 0.0 }
0x13c7   :  { %v2615_v35 = vpop.eup %2614  ;;  %1580 = vadd.xlane.f32.xlu0 %v1579_v29  ;;  %v2172_v29 = vld [vmem:[%s3268_s10 + $0x1] ss:$0 sm:$0xff] }
0x13c8   :  { %v1582_v36 = vsel %vm482_vm0, %v2615_v35, 0.0 }
0x13c9   :  { %1583 = vadd.xlane.f32.xlu1 %v1582_v36 }
0x13da   :  { %1639 = vrot.lane.b32.xlu1 %v3093_v11, %s2716_s3 }
0x13dd   :  { %1591 = vrot.lane.b32.xlu0 %v3091_v8, %s2716_s3 }
0x1454   :  { %v1581_v40 = vpop.xlane.xlu0 %1580 }
0x1455   :  { %2616 = vrcp.f32 %v1581_v40 }
0x1456   :  { %v1584_v37 = vpop.xlane.xlu1 %1583 }
0x1457   :  { %2618 = vrcp.f32 %v1584_v37  ;;  %v2173_v37 = vld [vmem:[%s3269_s11 + $0x1] ss:$0 sm:$0xff] }
0x1458   :  { %v1592_v38 = vpop.permute.xlu0 %1591 }
0x1459   :  { %v1597_v39 = vsel %vm512_vm1, %v1592_v38, 0 }
0x145a   :  { %2445 = vmatpush3.bf16.msra.mxu1 %v1597_v39  ;;  %v1640_v5 = vpop.permute.xlu1 %1639 }
0x145b   :  { %v1645_v6 = vsel %vm512_vm1, %v1640_v5, 0  ;;  %2456 = vmatprep.subr.bf16.mxu1 %v2710_v20 }
0x145c   :  { %2451 = vmatpush3.bf16.msra.mxu0 %v1645_v6 }
0x145d   :  { %2464 = vmatprep.subr.bf16.mxu0 %v2710_v20 }
0x145f   :  { %v2617_v11 = vpop.eup %2616 }
0x1460   :  { %v1587_v30 = vmul.f32 %v2617_v11, %v2613_v34  ;;  %v2566_v11 = vld [vmem:[%s3272_s14 + $0x20] sm:$0xff]  }
0x1461   :  { %v2619_v41 = vpop.eup %2618 }
0x1462   :  { %v1588_v8 = vmul.f32 %v2619_v41, %v2615_v35  ;;  %v1589_v42 = vpack.c.bf16 %v1587_v30, %v1587_v30  ;;  %v2567_v30 = vld [vmem:[%s3272_s14 + $0x28] sm:$0xff]   ;;  %v2568_v41 = vld [vmem:[%s3272_s14 + $0x30] sm:$0xff]  }
0x1464   :  { %2447 = vmatmul.mubr.msk.bf16.vlgmr.msra.gmra.mrb[44].mxu1 %vm482_vm0, %v1589_v42  ;;  %v1590_v43 = vpack.c.bf16 %v1588_v8, %v1588_v8  ;;  %v2569_v8 = vld [vmem:[%s3272_s14 + $0x38] sm:$0xff]   ;;  %v2179_v42 = vld [vmem:[%s3271_s13 + $0x1] ss:$0 sm:$0xff] }
0x1465   :  { %2460 = vmatprep.mubr.msk.bf16.mxu1 %vm2712_vm14, %v2710_v20  ;;  %2457 = vmatpush3.bf16.msra.mxu1 %v2562_v44 }
0x1466   :  { %2453 = vmatmul.mubr.msk.bf16.vlgmr.msra.gmra.mrb[36].mxu0 %vm482_vm0, %v1590_v43  ;;  %2458 = vmatprep.subr.bf16.mxu1 %v2710_v20 }
0x1467   :  { %2468 = vmatprep.mubr.msk.bf16.mxu0 %vm2712_vm14, %v2710_v20 }
0x1469   :  { %2459 = vmatpush3.bf16.msra.mxu1 %v2563_v45 }
0x146a   :  { %2472 = vmatprep.subr.bf16.mxu1 %v2710_v20 }
0x1537   :  { %v1633_v46 = vpop.f32.mrb[44].mxu1 }
0x1538   :  { %v2448_v47 = vpop.f32.mrb[45].mxu1 }
0x1539   :  { %v1636_v48 = vpop.f32.mrb[46].mxu1  ;;  %v1681_v49 = vpop.f32.mrb[36].mxu0 }
0x153a   :  { %v2545_v50 = vpack.i.bf16 %v1681_v49, %v1633_v46  ;;  %v2449_v13 = vpop.f32.mrb[47].mxu1  ;;  %v2454_v51 = vpop.f32.mrb[37].mxu0 }
0x153b   :  { %v1684_v52 = vpop.f32.mrb[38].mxu0 }
0x153c   :  { %v2455_v53 = vpop.f32.mrb[39].mxu0  ;;  %2546 = vrot.lane.b32.xlu1 %v2545_v50, %s2717_s8 }
0x15ae   :  { %v2547_v54 = vpop.permute.xlu1 %2546 }
0x15af   :  { %v2549_v55 = vunpack.i.h.bf16 %v2547_v54  ;;  %v2548_v56 = vunpack.i.l.bf16 %v2547_v54 }
0x15b1   :  { %v1696_v57 = vsel %vm382_vm15, %v3151_v0, %v2549_v55  ;;  %v1695_v58 = vsel %vm382_vm15, %v3149_v59, %v2548_v56 }
0x15b2   :  { %v1697_v16 = vpack.c.bf16 %v1696_v57, %v1695_v58 }
0x15b4   :  { %2461 = vmatmul.mubr.msk.bf16.vlgmr.msra.gmra.mrb[48].mxu1 %vm245_vm13, %v1697_v16 }
0x15b5   :  { %2480 = vmatprep.mubr.msk.bf16.mxu1 %vm2712_vm14, %v2710_v20  ;;  %2473 = vmatpush3.bf16.msra.mxu1 %v2566_v11 }
0x15b6   :  { %2474 = vmatprep.subr.bf16.mxu1 %v2710_v20 }
0x15b9   :  { %2475 = vmatpush3.bf16.msra.mxu1 %v2567_v30 }
0x15ba   :  { %2476 = vmatprep.subr.bf16.mxu1 %v2710_v20 }
0x15bd   :  { %2477 = vmatpush3.bf16.msra.mxu1 %v2568_v41 }
0x15be   :  { %2478 = vmatprep.subr.bf16.mxu1 %v2710_v20 }
0x15c1   :  { %2479 = vmatpush3.bf16.msra.mxu1 %v2569_v8 }
0x1687   :  { %v1760_v61 = vpop.f32.mrb[48].mxu1 }
0x1688   :  { %v1761_v1 = vadd.f32 %v2166_v60, %v1760_v61  ;;  %v2462_v2 = vpop.f32.mrb[49].mxu1 }
0x1689   :  { %v1763_v3 = vpop.f32.mrb[50].mxu1 }
0x168a   :  { %v1764_v4 = vadd.f32 %v2166_v60, %v1763_v3  ;;  %v2463_v7 = vpop.f32.mrb[51].mxu1  ;;  %v1767_v0 = vadd.f32 %v1761_v1, %v3079_v62 }
0x168c   :  { %v1773_v59 = vsel %vm245_vm13, %v1767_v0, 0.0  ;;  %v1768_v9 = vadd.f32 %v1764_v4, %v3081_v63  ;;  %v2564_v63 = vld [vmem:[%s3270_s12 + $0x10] sm:$0xff]  }
0x168d   :  { %1774 = vadd.xlane.f32.xlu0 %v1773_v59  ;;  %2465 = vmatpush3.bf16.msra.mxu0 %v2564_v63 }
0x168e   :  { %v1776_v10 = vsel %vm245_vm13, %v1768_v9, 0.0  ;;  %2466 = vmatprep.subr.bf16.mxu0 %v2710_v20 }
0x168f   :  { %1777 = vadd.xlane.f32.xlu1 %v1776_v10 }
0x1691   :  { %2467 = vmatpush3.bf16.msra.mxu0 %v2565_v26 }
0x1692   :  { %2484 = vmatprep.subr.bf16.mxu0 %v2710_v20 }
0x171a   :  { %v1775_v12 = vpop.xlane.xlu0 %1774 }
0x171b   :  { %v1779_v15 = vmul.f32 0.03125, %v1775_v12 }
0x171c   :  { %v1778_v17 = vpop.xlane.xlu1 %1777 }
0x171d   :  { %v1781_v18 = vsub.f32 %v1767_v0, %v1779_v15  ;;  %v1780_v21 = vmul.f32 0.03125, %v1778_v17  ;;  %v2192_v0 = vld [vmem:[%s3273_s15 + $0x1] ss:$0 sm:$0xff] }
0x171f   :  { %v1782_v22 = vsub.f32 %v1768_v9, %v1780_v21  ;;  %v1783_v23 = vmul.f32 %v1781_v18, %v1781_v18 }
0x1721   :  { %v1785_v24 = vsel %vm245_vm13, %v1783_v23, 0.0  ;;  %v1784_v25 = vmul.f32 %v1782_v22, %v1782_v22 }
0x1722   :  { %1786 = vadd.xlane.f32.xlu0 %v1785_v24 }
0x1723   :  { %v1788_v62 = vsel %vm245_vm13, %v1784_v25, 0.0 }
0x1726   :  { %1789 = vadd.xlane.f32.xlu0 %v1788_v62 }
0x17af   :  { %v1787_v19 = vpop.xlane.xlu0 %1786 }
0x17b0   :  { %v1791_v14 = vmul.f32 0.03125, %v1787_v19 }
0x17b2   :  { %v1793_v27 = vadd.f32 1e-12, %v1791_v14 }
0x17b3   :  { %v1790_v28 = vpop.xlane.xlu0 %1789 }
0x17b4   :  { %2620 = vrsqrt.f32 %v1793_v27  ;;  %v1792_v31 = vmul.f32 0.03125, %v1790_v28 }
0x17b6   :  { %v1794_v32 = vadd.f32 1e-12, %v1792_v31 }
0x17b8   :  { %2622 = vrsqrt.f32 %v1794_v32  ;;  %v2570_v32 = vld [vmem:[%s3276_s18] sm:$0xff]  }
0x17be   :  { %v2621_v33 = vpop.eup %2620 }
0x17bf   :  { %v1797_v34 = vmul.f32 %v2621_v33, %v1781_v18  ;;  %v2571_v33 = vld [vmem:[%s3276_s18 + $0x8] sm:$0xff]  }
0x17c1   :  { %v1805_v36 = vmul.f32 %v2172_v29, %v1797_v34 }
0x17c2   :  { %v2623_v35 = vpop.eup %2622 }
0x17c3   :  { %v1798_v40 = vmul.f32 %v2623_v35, %v1782_v22  ;;  %v1813_v39 = vadd.f32 %v2173_v37, %v1805_v36 }
0x17c5   :  { %v1806_v38 = vmul.f32 %v2172_v29, %v1798_v40 }
0x17c7   :  { %v1814_v5 = vadd.f32 %v2173_v37, %v1806_v38 }
0x17c9   :  { %v1815_v6 = vpack.c.bf16 %v1814_v5, %v1813_v39 }
0x17cb   :  { %2469 = vmatmul.mubr.msk.bf16.vlgmr.msra.gmra.mrb[40].mxu0 %vm245_vm13, %v1815_v6 }
0x17cc   :  { %2488 = vmatprep.mubr.msk.bf16.mxu0 %vm2712_vm14, %v2710_v20  ;;  %2485 = vmatpush3.bf16.msra.mxu0 %v2570_v32 }
0x17cd   :  { %2486 = vmatprep.subr.bf16.mxu0 %v2710_v20  ;;  %v2201_v20 = vld [vmem:[%s3275_s17 + $0x1] ss:$0 sm:$0xff] }
0x17d0   :  { %2487 = vmatpush3.bf16.msra.mxu0 %v2571_v33 }
0x189e   :  { %v1878_v43 = vpop.f32.mrb[40].mxu0 }
0x189f   :  { %v1879_v44 = vadd.f32 %v2179_v42, %v1878_v43  ;;  %v2470_v45 = vpop.f32.mrb[41].mxu0 }
0x18a0   :  { %v1881_v46 = vpop.f32.mrb[42].mxu0 }
0x18a1   :  { %v1885_v47 = vmul.f32 %v1879_v44, %v1879_v44  ;;  %v1882_v48 = vadd.f32 %v2179_v42, %v1881_v46  ;;  %v2471_v49 = vpop.f32.mrb[43].mxu0 }
0x18a3   :  { %v1887_v50 = vmul.f32 %v1885_v47, %v1879_v44  ;;  %v1886_v13 = vmul.f32 %v1882_v48, %v1882_v48 }
0x18a5   :  { %v1889_v51 = vmul.f32 0.044715, %v1887_v50  ;;  %v1888_v52 = vmul.f32 %v1886_v13, %v1882_v48 }
0x18a7   :  { %v1891_v53 = vadd.f32 %v1889_v51, %v1879_v44  ;;  %v1890_v54 = vmul.f32 0.044715, %v1888_v52 }
0x18a9   :  { %v1893_v55 = vmul.f32 0.7978846, %v1891_v53  ;;  %v1892_v56 = vadd.f32 %v1890_v54, %v1882_v48 }
0x18ab   :  { %2624 = vtanh.f32 %v1893_v55  ;;  %v1894_v57 = vmul.f32 0.7978846, %v1892_v56 }
0x18ad   :  { %2626 = vtanh.f32 %v1894_v57 }
0x18b5   :  { %v2625_v58 = vpop.eup %2624 }
0x18b6   :  { %v1897_v16 = vadd.f32 1.0, %v2625_v58 }
0x18b7   :  { %v2627_v60 = vpop.eup %2626 }
0x18b8   :  { %v1899_v61 = vmul.f32 0.5, %v1897_v16  ;;  %v1898_v1 = vadd.f32 1.0, %v2627_v60 }
0x18ba   :  { %v1900_v2 = vmul.f32 0.5, %v1898_v1  ;;  %v1901_v3 = vmul.f32 %v1899_v61, %v1879_v44  ;;  %v2202_v44 = vld [vmem:[%s3277_s19] ss:$0 sm:$0xff] }
0x18bc   :  { %v1902_v4 = vmul.f32 %v1900_v2, %v1882_v48 }
0x18be   :  { %v1903_v7 = vpack.c.bf16 %v1902_v4, %v1901_v3 }
0x18c0   :  { %2481 = vmatmul.mubr.msk.bf16.vlgmr.msra.gmra.mrb[52].mxu1 %vm1078_vm2, %v1903_v7 }
0x1993   :  { %v1982_v59 = vpop.f32.mrb[52].mxu1 }
0x1994   :  { %v1983_v9 = vadd.f32 %v2192_v0, %v1982_v59  ;;  %v2482_v10 = vpop.f32.mrb[53].mxu1 }
0x1995   :  { %v1985_v12 = vpop.f32.mrb[54].mxu1 }
0x1996   :  { %v1986_v15 = vadd.f32 %v2192_v0, %v1985_v12  ;;  %v2483_v17 = vpop.f32.mrb[55].mxu1  ;;  %v1989_v18 = vadd.f32 %v1983_v9, %v1813_v39  ;;  %v2200_v39 = vld [vmem:[%s3274_s16 + $0x1] ss:$0 sm:$0xff] }
0x1998   :  { %v1995_v21 = vsel %vm245_vm13, %v1989_v18, 0.0  ;;  %v1990_v22 = vadd.f32 %v1986_v15, %v1814_v5 }
0x1999   :  { %1996 = vadd.xlane.f32.xlu1 %v1995_v21 }
0x199a   :  { %v1998_v23 = vsel %vm245_vm13, %v1990_v22, 0.0 }
0x199b   :  { %1999 = vadd.xlane.f32.xlu0 %v1998_v23 }
0x1a26   :  { %v1997_v24 = vpop.xlane.xlu1 %1996 }
0x1a27   :  { %v2001_v25 = vmul.f32 0.03125, %v1997_v24 }
0x1a28   :  { %v2000_v62 = vpop.xlane.xlu0 %1999 }
0x1a29   :  { %v2003_v63 = vsub.f32 %v1989_v18, %v2001_v25  ;;  %v2002_v26 = vmul.f32 0.03125, %v2000_v62 }
0x1a2b   :  { %v2004_v19 = vsub.f32 %v1990_v22, %v2002_v26  ;;  %v2005_v14 = vmul.f32 %v2003_v63, %v2003_v63 }
0x1a2d   :  { %v2007_v27 = vsel %vm245_vm13, %v2005_v14, 0.0  ;;  %v2006_v28 = vmul.f32 %v2004_v19, %v2004_v19 }
0x1a2e   :  { %2008 = vadd.xlane.f32.xlu1 %v2007_v27 }
0x1a2f   :  { %v2010_v31 = vsel %vm245_vm13, %v2006_v28, 0.0 }
0x1a30   :  { %2011 = vadd.xlane.f32.xlu0 %v2010_v31 }
0x1abb   :  { %v2009_v34 = vpop.xlane.xlu1 %2008 }
0x1abc   :  { %v2013_v29 = vmul.f32 0.03125, %v2009_v34 }
0x1abd   :  { %v2012_v35 = vpop.xlane.xlu0 %2011 }
0x1abe   :  { %v2015_v36 = vadd.f32 1e-12, %v2013_v29  ;;  %v2014_v40 = vmul.f32 0.03125, %v2012_v35 }
0x1ac0   :  { %2628 = vrsqrt.f32 %v2015_v36  ;;  %v2016_v37 = vadd.f32 1e-12, %v2014_v40 }
0x1ac2   :  { %2630 = vrsqrt.f32 %v2016_v37 }
0x1aca   :  { %v2629_v38 = vpop.eup %2628 }
0x1acb   :  { %v2019_v5 = vmul.f32 %v2629_v38, %v2003_v63 }
0x1acc   :  { %v2631_v6 = vpop.eup %2630 }
0x1acd   :  { %v2027_v11 = vmul.f32 %v2200_v39, %v2019_v5  ;;  %v2020_v30 = vmul.f32 %v2631_v6, %v2004_v19 }
0x1acf   :  { %v2028_v41 = vmul.f32 %v2200_v39, %v2020_v30  ;;  %v2035_v8 = vadd.f32 %v2201_v20, %v2027_v11 }
0x1ad1   :  { %v2036_v42 = vadd.f32 %v2201_v20, %v2028_v41 }
0x1ad3   :  { %v2037_v43 = vpack.c.bf16 %v2036_v42, %v2035_v8 }
0x1ad5   :  { %2489 = vmatmul.mubr.msk.bf16.vlgmr.msra.gmra.mrb[44].mxu0 %vm245_vm13, %v2037_v43 }
0x1ba8   :  { %v2098_v45 = vpop.f32.mrb[44].mxu0 }
0x1ba9   :  { %v2099_v46 = vadd.f32 %v2202_v44, %v2098_v45  ;;  %v2490_v47 = vpop.f32.mrb[45].mxu0 }
0x1baa   :  { %v2101_v48 = vpop.f32.mrb[46].mxu0 }
0x1bab   :  { %2105 = vst [vmem:[%s3298_s25] sm:$0xff] %v2099_v46  ;;  %v2102_v49 = vadd.f32 %v2202_v44, %v2101_v48  ;;  %v2491_v50 = vpop.f32.mrb[47].mxu0 }
0x1bad   :  { %2106 = vst [vmem:[%s3298_s25 + $0x8] sm:$0xff] %v2102_v49 }
0x1bae   :  { %2111 = vsyncpa [#allocation3], 1 }
0x1baf   :  { %2112 = vsyncpa [#allocation5], 1 }

</bundles_post_ra>
